<compile_context>
chip_gen: v7x
topology: tpu7x:2x2x1
jax: 0.10.0
libtpu: 0.0.40
codegen_flags: <defaults>
</compile_context>

<pallas_src>
import functools

import jax
import jax.numpy as jnp
from jax import lax
from jax.experimental import pallas as pl
from jax.experimental.pallas import tpu as pltpu

NORM_EPS = 1e-6
LAYER_SCALE_INIT = 1e-5
NEG_INF = -1e9
_MIB = 1024 * 1024


def _round_up(x, m):
    return (x + m - 1) // m * m


def _clamp_vmem(nbytes):
    # Explicit scoped-VMEM request: at least the 32 MiB v6e default, never more
    # than v7x's 64 MiB physical per-TensorCore budget.
    return int(min(max(nbytes, 32 * _MIB), 64 * _MIB))


def _rms_norm(x, w, eps=NORM_EPS):
    var = jnp.mean(x * x, axis=-1, keepdims=True)
    return x * lax.rsqrt(var + eps) * w


# ---------------------------------------------------------------------------
# Kernel 1: cross attention (one batch element per grid step)
# ---------------------------------------------------------------------------
def _cross_attn_kernel(hidden_ref, context_ref, mask_bias_ref,
                       ln_w_ref, wq_ref, bq_ref, wk_ref, bk_ref,
                       wv_ref, bv_ref, qn_w_ref, kn_w_ref,
                       wo_ref, bo_ref, gamma_ref, out_ref,
                       *, num_heads, num_kv_heads, head_dim):
    f32 = jnp.float32
    bf16 = jnp.bfloat16
    hd = head_dim

    x = hidden_ref[0]                       # (Nt, D)   f32
    ctx = context_ref[0]                    # (Nc, Dc)  f32
    bias = mask_bias_ref[...]               # (1, 1, Nc) additive mask bias

    xn = _rms_norm(x, ln_w_ref[...])

    # Full-width bf16 projections (MXU), f32 accumulation, f32 bias add.
    xb = xn.astype(bf16)
    cb = ctx.astype(bf16)
    q = jnp.dot(xb, wq_ref[...], preferred_element_type=f32) + bq_ref[...]   # (Nt, D)
    k = jnp.dot(cb, wk_ref[...], preferred_element_type=f32) + bk_ref[...]   # (Nc, Kv*hd)
    v = jnp.dot(cb, wv_ref[...], preferred_element_type=f32) + bv_ref[...]   # (Nc, Kv*hd)

    # Split heads onto a leading (batch) axis: lane-slices + major-axis stack only
    # (no lane-splitting reshape of the activations).
    q3 = jnp.stack([q[:, h * hd:(h + 1) * hd] for h in range(num_heads)], axis=0)
    k3 = jnp.stack([k[:, g * hd:(g + 1) * hd] for g in range(num_kv_heads)], axis=0)
    v3 = jnp.stack([v[:, g * hd:(g + 1) * hd] for g in range(num_kv_heads)], axis=0)

    # Per-head RMSNorm (batched over all heads).  The attention scale is folded
    # into qn_w by the wrapper, so no extra per-head multiply is needed here.
    qn = q3 * lax.rsqrt(jnp.mean(q3 * q3, axis=-1, keepdims=True) + NORM_EPS) * qn_w_ref[...]
    kn = k3 * lax.rsqrt(jnp.mean(k3 * k3, axis=-1, keepdims=True) + NORM_EPS) * kn_w_ref[...]

    # GQA: expand kv heads to full head count (major-dim broadcast + reshape only).
    group = num_heads // num_kv_heads
    nc = k3.shape[1]
    if group > 1:
        kn = jnp.broadcast_to(kn[:, None], (num_kv_heads, group, nc, hd)
                              ).reshape(num_heads, nc, hd)
        v3 = jnp.broadcast_to(v3[:, None], (num_kv_heads, group, nc, hd)
                              ).reshape(num_heads, nc, hd)

    # Batched attention over all heads; softmax math stays in f32.
    scores = jnp.einsum('hqd,hkd->hqk', qn.astype(bf16), kn.astype(bf16),
                        preferred_element_type=f32)                          # (H, Nt, Nc)
    scores = scores + bias
    scores = scores - jnp.max(scores, axis=-1, keepdims=True)
    p = jnp.exp(scores)
    p = p * pl.reciprocal(jnp.sum(p, axis=-1, keepdims=True), approx=True)

    attn = jnp.einsum('hqk,hkd->hqd', p.astype(bf16), v3.astype(bf16),
                      preferred_element_type=f32)                            # (H, Nt, hd)

    # Output projection with head-split weights (H, hd, D): batched matmul then a
    # major-axis sum over heads (replaces the old lane-dim concatenate).
    y = jnp.einsum('hqd,hde->hqe', attn.astype(bf16), wo_ref[...],
                   preferred_element_type=f32)
    y = jnp.sum(y, axis=0) + bo_ref[...]                                     # (Nt, D)

    out_ref[0] = x + gamma_ref[...] * y


# ---------------------------------------------------------------------------
# Kernel 2: MoE FFN, grid = (token_tiles, experts); expert weights streamed
# ---------------------------------------------------------------------------
def _moe_kernel(h_ref, ln_w_ref, router_w_ref, gate_ref, up_ref, down_ref,
                gamma_ref, out_ref, logits_ref, xn_scr, w_scr, acc_scr,
                *, num_experts, top_k, norm_topk_prob):
    f32 = jnp.float32
    e = pl.program_id(1)

    # First expert step for this token tile: RMSNorm + router + top-k routing,
    # cached in VMEM scratch; init the accumulator.
    @pl.when(e == 0)
    def _():
        x = h_ref[...]                                       # (Tt, D) f32
        xn = _rms_norm(x, ln_w_ref[...])
        xnb = xn.astype(jnp.bfloat16)
        xn_scr[...] = xnb

        logits = jnp.dot(xnb, router_w_ref[...], preferred_element_type=f32)  # (Tt, E)
        logits_ref[...] = logits

        probs = jnp.exp(logits - jnp.max(logits, axis=-1, keepdims=True))
        probs = probs * pl.reciprocal(jnp.sum(probs, axis=-1, keepdims=True),
                                      approx=True)

        # top-k selection mask (iterative max, lowest-index tie break)
        idx = lax.broadcasted_iota(jnp.int32, probs.shape, 1)
        remaining = probs
        sel = jnp.zeros(probs.shape, dtype=jnp.bool_)
        for _ in range(top_k):
            m = jnp.max(remaining, axis=-1, keepdims=True)
            is_max = remaining >= m
            pick_idx = jnp.min(jnp.where(is_max, idx, num_experts),
                               axis=-1, keepdims=True)
            pick = idx == pick_idx
            sel = jnp.logical_or(sel, pick)
            remaining = jnp.where(pick, -1.0, remaining)

        weights = jnp.where(sel, probs, 0.0)
        if norm_topk_prob:
            weights = weights * pl.reciprocal(
                jnp.sum(weights, axis=-1, keepdims=True), approx=True)
        w_scr[...] = weights
        acc_scr[...] = jnp.zeros_like(acc_scr)

    # One streamed expert per grid step: SwiGLU with bf16 weights, f32 accumulation.
    xnb = xn_scr[...]
    g = jnp.dot(xnb, gate_ref[0], preferred_element_type=f32)
    u = jnp.dot(xnb, up_ref[0], preferred_element_type=f32)
    inter = (g * jax.nn.sigmoid(g)) * u                      # SiLU(gate) * up
    ye = jnp.dot(inter.astype(jnp.bfloat16), down_ref[0], preferred_element_type=f32)

    # Per-token routing weight for this expert (lane select + reduce).
    lane = lax.broadcasted_iota(jnp.int32, w_scr.shape, 1)
    w_e = jnp.sum(jnp.where(lane == e, w_scr[...], 0.0), axis=-1, keepdims=True)
    acc_scr[...] += w_e * ye

    @pl.when(e == num_experts - 1)
    def _():
        out_ref[...] = h_ref[...] + gamma_ref[...] * acc_scr[...]


# ---------------------------------------------------------------------------
# Wrapper
# ---------------------------------------------------------------------------
def cross_modal_decoder_layer(params, hidden_states, context, context_mask,
                              *, num_heads, num_kv_heads, num_experts, top_k,
                              norm_topk_prob=True, qk_scale=None):
    B, Nt, D = hidden_states.shape
    _, Nc, Dc = context.shape
    head_dim = D // num_heads
    kv_dim = num_kv_heads * head_dim
    scale = qk_scale if qk_scale is not None else head_dim ** -0.5
    bf16 = jnp.bfloat16

    # ----- cross attention -------------------------------------------------
    # context_mask: True = valid  ->  additive bias
    mask_bias = jnp.where(context_mask, 0.0, NEG_INF).astype(jnp.float32)[:, None, :]

    qn_w = (params['qn_w'] * scale).reshape(1, 1, head_dim).astype(jnp.float32)
    kn_w = params['kn_w'].reshape(1, 1, head_dim).astype(jnp.float32)
    wo_h = params['wo'].astype(bf16).reshape(num_heads, head_dim, D)

    weight_args = [
        params['ca_ln_w'],
        params['wq'].astype(bf16), params['bq'],
        params['wk'].astype(bf16), params['bk'],
        params['wv'].astype(bf16), params['bv'],
        qn_w, kn_w,
        wo_h, params['bo'],
        params['gamma_ca'],
    ]

    def _const_spec(arr):
        nd = arr.ndim
        return pl.BlockSpec(arr.shape, lambda b, _nd=nd: (0,) * _nd)

    attn_weight_bytes = sum(int(w.size * w.dtype.itemsize) for w in weight_args)
    attn_vmem = _clamp_vmem(
        attn_weight_bytes
        + 4 * (Nt * D + Nc * Dc + Nc) * 4           # double-buffered act blocks in/out
        + 4 * num_heads * Nt * Nc * 4               # score/prob temporaries
        + 4 * (Nt * D + 2 * Nc * kv_dim) * 4        # q/k/v temporaries
        + 4 * _MIB)

    attn_kernel = functools.partial(_cross_attn_kernel, num_heads=num_heads,
                                    num_kv_heads=num_kv_heads, head_dim=head_dim)

    # TODO(synk): for long sequences, tile Nt with a flash-style online softmax
    # instead of materializing the full (H, Nt, Nc) score tensor per batch.
    h_attn = pl.pallas_call(
        attn_kernel,
        grid=(B,),
        in_specs=[
            pl.BlockSpec((1, Nt, D), lambda b: (b, 0, 0)),
            pl.BlockSpec((1, Nc, Dc), lambda b: (b, 0, 0)),
            pl.BlockSpec((1, 1, Nc), lambda b: (b, 0, 0)),
        ] + [_const_spec(w) for w in weight_args],
        out_specs=pl.BlockSpec((1, Nt, D), lambda b: (b, 0, 0)),
        out_shape=jax.ShapeDtypeStruct((B, Nt, D), jnp.float32),
        compiler_params=pltpu.CompilerParams(
            dimension_semantics=("parallel",),
            vmem_limit_bytes=attn_vmem),
    )(hidden_states, context, mask_bias, *weight_args)

    # ----- MoE FFN ----------------------------------------------------------
    T = B * Nt
    inter_dim = params['gate_w'].shape[-1]

    token_tile = min(256, _round_up(T, 8))
    T_pad = _round_up(T, token_tile)
    flat = h_attn.reshape(T, D)
    if T_pad != T:
        flat = jnp.pad(flat, ((0, T_pad - T), (0, 0)))
    n_tiles = T_pad // token_tile

    router_w = params['router_w'].astype(bf16)
    gate_w = params['gate_w'].astype(bf16)      # (E, D, I)
    up_w = params['up_w'].astype(bf16)          # (E, D, I)
    down_w = params['down_w'].astype(bf16)      # (E, I, D)

    moe_vmem = _clamp_vmem(
        2 * 3 * D * inter_dim * 2                           # double-buffered expert weights
        + 4 * token_tile * D * 4                            # h in / out blocks
        + 2 * token_tile * num_experts * 4                  # logits block
        + token_tile * (D * 2 + D * 4 + num_experts * 4)    # VMEM scratch
        + 3 * token_tile * inter_dim * 4                    # gate/up/SwiGLU temporaries
        + 4 * _MIB)

    moe_kernel = functools.partial(_moe_kernel, num_experts=num_experts,
                                   top_k=top_k, norm_topk_prob=norm_topk_prob)

    out_flat, router_logits = pl.pallas_call(
        moe_kernel,
        grid=(n_tiles, num_experts),
        in_specs=[
            pl.BlockSpec((token_tile, D), lambda t, e: (t, 0)),       # h (resident over e)
            pl.BlockSpec((1, D), lambda t, e: (0, 0)),                # post-attn RMSNorm w
            pl.BlockSpec((D, num_experts), lambda t, e: (0, 0)),      # router
            pl.BlockSpec((1, D, inter_dim), lambda t, e: (e, 0, 0)),  # gate (streamed)
            pl.BlockSpec((1, D, inter_dim), lambda t, e: (e, 0, 0)),  # up   (streamed)
            pl.BlockSpec((1, inter_dim, D), lambda t, e: (e, 0, 0)),  # down (streamed)
            pl.BlockSpec((1, D), lambda t, e: (0, 0)),                # gamma_ffn
        ],
        out_specs=(
            pl.BlockSpec((token_tile, D), lambda t, e: (t, 0)),
            pl.BlockSpec((token_tile, num_experts), lambda t, e: (t, 0)),
        ),
        out_shape=(jax.ShapeDtypeStruct((T_pad, D), jnp.float32),
                   jax.ShapeDtypeStruct((T_pad, num_experts), jnp.float32)),
        scratch_shapes=[
            pltpu.VMEM((token_tile, D), jnp.bfloat16),           # normalized tokens
            pltpu.VMEM((token_tile, num_experts), jnp.float32),  # routing weights
            pltpu.VMEM((token_tile, D), jnp.float32),            # accumulator
        ],
        input_output_aliases={0: 0},                             # consume h_attn in place
        compiler_params=pltpu.CompilerParams(
            dimension_semantics=("parallel", "arbitrary"),
            vmem_limit_bytes=moe_vmem),
    )(flat, params['post_ln_w'], router_w, gate_w, up_w, down_w,
      params['gamma_ffn'])

    out = out_flat[:T].reshape(B, Nt, D)
    return out, router_logits[:T]


def init_params(key, dim, context_dim, num_heads, num_kv_heads, num_experts,
                intermediate):
    head_dim = dim // num_heads
    kv_dim = num_kv_heads * head_dim
    keys = jax.random.split(key, 12)

    def lin(k, shape, scl=0.02):
        return (scl * jax.random.normal(k, shape)).astype(jnp.float32)

    return dict(
        ca_ln_w=jnp.ones((1, dim), jnp.float32),
        wq=lin(keys[0], (dim, dim)),        bq=lin(keys[1], (1, dim), 0.01),
        wk=lin(keys[2], (context_dim, kv_dim)), bk=lin(keys[3], (1, kv_dim), 0.01),
        wv=lin(keys[4], (context_dim, kv_dim)), bv=lin(keys[5], (1, kv_dim), 0.01),
        # q/k per-head RMSNorm weights (DecoderCrossAttention with norm_layer=RMSNorm)
        qn_w=jnp.ones((1, head_dim), jnp.float32),
        kn_w=jnp.ones((1, head_dim), jnp.float32),
        wo=lin(keys[6], (dim, dim)),        bo=lin(keys[7], (1, dim), 0.01),
        gamma_ca=jnp.full((1, dim), LAYER_SCALE_INIT, jnp.float32),
        post_ln_w=jnp.ones((1, dim), jnp.float32),
        router_w=lin(keys[8], (dim, num_experts)),
        gate_w=lin(keys[9], (num_experts, dim, intermediate)),
        up_w=lin(keys[10], (num_experts, dim, intermediate)),
        down_w=lin(keys[11], (num_experts, intermediate, dim)),
        gamma_ffn=jnp.full((1, dim), LAYER_SCALE_INIT, jnp.float32),
    )


if __name__ == "__main__":
    # Small shapes consistent with the module's forward:
    # hidden_states (B, N_text, dim), context (B, N_img, context_dim)
    B, Nt, Nc = 2, 8, 16
    dim, context_dim = 32, 64
    num_heads, num_kv_heads = 4, 2          # GQA
    num_experts, top_k = 4, 2
    mlp_ratio = 4.0
    intermediate = int(dim * mlp_ratio)

    key = jax.random.PRNGKey(0)
    k_h, k_c, k_p = jax.random.split(key, 3)
    hidden = jax.random.normal(k_h, (B, Nt, dim), dtype=jnp.float32)
    context = jax.random.normal(k_c, (B, Nc, context_dim), dtype=jnp.float32)
    # True = valid image token; mask out last 4 tokens of batch 1
    context_mask = jnp.ones((B, Nc), dtype=bool).at[1, -4:].set(False)

    params = init_params(k_p, dim, context_dim, num_heads, num_kv_heads,
                         num_experts, intermediate)

    layer = jax.jit(functools.partial(
        cross_modal_decoder_layer,
        num_heads=num_heads, num_kv_heads=num_kv_heads,
        num_experts=num_experts, top_k=top_k, norm_topk_prob=True))

    out, router_logits = layer(params, hidden, context, context_mask)
    jax.block_until_ready(out)
    jax.block_until_ready(router_logits)
    assert out.shape == (B, Nt, dim)
    assert router_logits.shape == (B * Nt, num_experts)
    print("KERNEL_OK")
</pallas_src>

<mosaic_0001>
module attributes {stable_mosaic.version = 11 : i64} {
  func.func @_cross_attn_kernel(%arg0: i32, %arg1: memref<1x8x32xf32, #tpu.memory_space<vmem>>, %arg2: memref<1x16x64xf32, #tpu.memory_space<vmem>>, %arg3: memref<1x1x16xf32, #tpu.memory_space<vmem>>, %arg4: memref<1x32xf32, #tpu.memory_space<vmem>>, %arg5: memref<32x32xbf16, #tpu.memory_space<vmem>>, %arg6: memref<1x32xf32, #tpu.memory_space<vmem>>, %arg7: memref<64x16xbf16, #tpu.memory_space<vmem>>, %arg8: memref<1x16xf32, #tpu.memory_space<vmem>>, %arg9: memref<64x16xbf16, #tpu.memory_space<vmem>>, %arg10: memref<1x16xf32, #tpu.memory_space<vmem>>, %arg11: memref<1x1x8xf32, #tpu.memory_space<vmem>>, %arg12: memref<1x1x8xf32, #tpu.memory_space<vmem>>, %arg13: memref<4x8x32xbf16, #tpu.memory_space<vmem>>, %arg14: memref<1x32xf32, #tpu.memory_space<vmem>>, %arg15: memref<1x32xf32, #tpu.memory_space<vmem>>, %arg16: memref<1x8x32xf32, #tpu.memory_space<vmem>>) attributes {dimension_semantics = [#tpu.dimension_semantics<parallel>], iteration_bounds = array<i64: 2>, scalar_prefetch = 0 : i64, scratch_operands = 0 : i64, tpu.core_type = #tpu.core_type<tc>, window_params = [{transform_indices = @transform_0, window_bounds = array<i64: 1, 8, 32>}, {transform_indices = @transform_1, window_bounds = array<i64: 1, 16, 64>}, {transform_indices = @transform_2, window_bounds = array<i64: 1, 1, 16>}, {pipeline_mode = #tpu.pipeline_mode<synchronous>, transform_indices = @transform_3, window_bounds = array<i64: 1, 32>}, {pipeline_mode = #tpu.pipeline_mode<synchronous>, transform_indices = @transform_4, window_bounds = array<i64: 32, 32>}, {pipeline_mode = #tpu.pipeline_mode<synchronous>, transform_indices = @transform_5, window_bounds = array<i64: 1, 32>}, {pipeline_mode = #tpu.pipeline_mode<synchronous>, transform_indices = @transform_6, window_bounds = array<i64: 64, 16>}, {pipeline_mode = #tpu.pipeline_mode<synchronous>, transform_indices = @transform_7, window_bounds = array<i64: 1, 16>}, {pipeline_mode = #tpu.pipeline_mode<synchronous>, transform_indices = @transform_8, window_bounds = array<i64: 64, 16>}, {pipeline_mode = #tpu.pipeline_mode<synchronous>, transform_indices = @transform_9, window_bounds = array<i64: 1, 16>}, {pipeline_mode = #tpu.pipeline_mode<synchronous>, transform_indices = @transform_10, window_bounds = array<i64: 1, 1, 8>}, {pipeline_mode = #tpu.pipeline_mode<synchronous>, transform_indices = @transform_11, window_bounds = array<i64: 1, 1, 8>}, {pipeline_mode = #tpu.pipeline_mode<synchronous>, transform_indices = @transform_12, window_bounds = array<i64: 4, 8, 32>}, {pipeline_mode = #tpu.pipeline_mode<synchronous>, transform_indices = @transform_13, window_bounds = array<i64: 1, 32>}, {pipeline_mode = #tpu.pipeline_mode<synchronous>, transform_indices = @transform_14, window_bounds = array<i64: 1, 32>}, {transform_indices = @transform_15, window_bounds = array<i64: 1, 8, 32>}]} {
    %c0 = arith.constant 0 : index
    %c0_0 = arith.constant 0 : index
    %c0_1 = arith.constant 0 : index
    %0 = vector.load %arg1[%c0, %c0_0, %c0_1] : memref<1x8x32xf32, #tpu.memory_space<vmem>>, vector<1x8x32xf32>
    %1 = vector.shape_cast %0 : vector<1x8x32xf32> to vector<8x32xf32>
    %c0_2 = arith.constant 0 : index
    %c0_3 = arith.constant 0 : index
    %c0_4 = arith.constant 0 : index
    %2 = vector.load %arg2[%c0_2, %c0_3, %c0_4] : memref<1x16x64xf32, #tpu.memory_space<vmem>>, vector<1x16x64xf32>
    %3 = vector.shape_cast %2 : vector<1x16x64xf32> to vector<16x64xf32>
    %c0_5 = arith.constant 0 : index
    %c0_6 = arith.constant 0 : index
    %c0_7 = arith.constant 0 : index
    %4 = vector.load %arg3[%c0_5, %c0_6, %c0_7] : memref<1x1x16xf32, #tpu.memory_space<vmem>>, vector<1x1x16xf32>
    %c0_8 = arith.constant 0 : index
    %c0_9 = arith.constant 0 : index
    %5 = vector.load %arg4[%c0_8, %c0_9] : memref<1x32xf32, #tpu.memory_space<vmem>>, vector<1x32xf32>
    %6 = arith.mulf %1, %1 : vector<8x32xf32>
    %cst = arith.constant dense<0.000000e+00> : vector<8xf32>
    %7 = vector.multi_reduction <add>, %6, %cst [1] : vector<8x32xf32> to vector<8xf32>
    %8 = vector.shape_cast %7 : vector<8xf32> to vector<8x1xf32>
    %cst_10 = arith.constant 3.200000e+01 : f32
    %9 = vector.broadcast %cst_10 : f32 to vector<8x1xf32>
    %10 = arith.divf %8, %9 : vector<8x1xf32>
    %cst_11 = arith.constant 9.99999997E-7 : f32
    %11 = vector.broadcast %cst_11 : f32 to vector<8x1xf32>
    %12 = arith.addf %10, %11 : vector<8x1xf32>
    %13 = math.rsqrt %12 : vector<8x1xf32>
    %14 = vector.broadcast %13 : vector<8x1xf32> to vector<8x32xf32>
    %15 = arith.mulf %1, %14 : vector<8x32xf32>
    %16 = vector.broadcast %5 : vector<1x32xf32> to vector<8x32xf32>
    %17 = arith.mulf %15, %16 : vector<8x32xf32>
    %18 = arith.truncf %17 : vector<8x32xf32> to vector<8x32xbf16>
    %19 = arith.truncf %3 : vector<16x64xf32> to vector<16x64xbf16>
    %c0_12 = arith.constant 0 : index
    %c0_13 = arith.constant 0 : index
    %20 = vector.load %arg5[%c0_12, %c0_13] : memref<32x32xbf16, #tpu.memory_space<vmem>>, vector<32x32xbf16>
    %cst_14 = arith.constant dense<0.000000e+00> : vector<8x32xf32>
    %21 = tpu.matmul %18, %20, %cst_14 {dimension_numbers = #tpu.dot_dimension_numbers<[1], [0], [0], [1], [0, 0, 1, 1], [], []>} : vector<8x32xbf16>, vector<32x32xbf16>, vector<8x32xf32> -> vector<8x32xf32>
    %c0_15 = arith.constant 0 : index
    %c0_16 = arith.constant 0 : index
    %22 = vector.load %arg6[%c0_15, %c0_16] : memref<1x32xf32, #tpu.memory_space<vmem>>, vector<1x32xf32>
    %23 = vector.broadcast %22 : vector<1x32xf32> to vector<8x32xf32>
    %24 = arith.addf %21, %23 : vector<8x32xf32>
    %c0_17 = arith.constant 0 : index
    %c0_18 = arith.constant 0 : index
    %25 = vector.load %arg7[%c0_17, %c0_18] : memref<64x16xbf16, #tpu.memory_space<vmem>>, vector<64x16xbf16>
    %cst_19 = arith.constant dense<0.000000e+00> : vector<16x16xf32>
    %26 = tpu.matmul %19, %25, %cst_19 {dimension_numbers = #tpu.dot_dimension_numbers<[1], [0], [0], [1], [0, 0, 1, 1], [], []>} : vector<16x64xbf16>, vector<64x16xbf16>, vector<16x16xf32> -> vector<16x16xf32>
    %c0_20 = arith.constant 0 : index
    %c0_21 = arith.constant 0 : index
    %27 = vector.load %arg8[%c0_20, %c0_21] : memref<1x16xf32, #tpu.memory_space<vmem>>, vector<1x16xf32>
    %28 = vector.broadcast %27 : vector<1x16xf32> to vector<16x16xf32>
    %29 = arith.addf %26, %28 : vector<16x16xf32>
    %c0_22 = arith.constant 0 : index
    %c0_23 = arith.constant 0 : index
    %30 = vector.load %arg9[%c0_22, %c0_23] : memref<64x16xbf16, #tpu.memory_space<vmem>>, vector<64x16xbf16>
    %cst_24 = arith.constant dense<0.000000e+00> : vector<16x16xf32>
    %31 = tpu.matmul %19, %30, %cst_24 {dimension_numbers = #tpu.dot_dimension_numbers<[1], [0], [0], [1], [0, 0, 1, 1], [], []>} : vector<16x64xbf16>, vector<64x16xbf16>, vector<16x16xf32> -> vector<16x16xf32>
    %c0_25 = arith.constant 0 : index
    %c0_26 = arith.constant 0 : index
    %32 = vector.load %arg10[%c0_25, %c0_26] : memref<1x16xf32, #tpu.memory_space<vmem>>, vector<1x16xf32>
    %33 = vector.broadcast %32 : vector<1x16xf32> to vector<16x16xf32>
    %34 = arith.addf %31, %33 : vector<16x16xf32>
    %35 = vector.extract_strided_slice %24 {offsets = [0, 0], sizes = [8, 8], strides = [1, 1]} : vector<8x32xf32> to vector<8x8xf32>
    %36 = vector.extract_strided_slice %24 {offsets = [0, 8], sizes = [8, 8], strides = [1, 1]} : vector<8x32xf32> to vector<8x8xf32>
    %37 = vector.extract_strided_slice %24 {offsets = [0, 16], sizes = [8, 8], strides = [1, 1]} : vector<8x32xf32> to vector<8x8xf32>
    %38 = vector.extract_strided_slice %24 {offsets = [0, 24], sizes = [8, 8], strides = [1, 1]} : vector<8x32xf32> to vector<8x8xf32>
    %39 = vector.shape_cast %35 : vector<8x8xf32> to vector<1x8x8xf32>
    %40 = vector.shape_cast %36 : vector<8x8xf32> to vector<1x8x8xf32>
    %41 = vector.shape_cast %37 : vector<8x8xf32> to vector<1x8x8xf32>
    %42 = vector.shape_cast %38 : vector<8x8xf32> to vector<1x8x8xf32>
    %43 = tpu.concatenate %39, %40, %41, %42 in 0 : vector<1x8x8xf32>, vector<1x8x8xf32>, vector<1x8x8xf32>, vector<1x8x8xf32> -> vector<4x8x8xf32>
    %44 = vector.extract_strided_slice %29 {offsets = [0, 0], sizes = [16, 8], strides = [1, 1]} : vector<16x16xf32> to vector<16x8xf32>
    %45 = vector.extract_strided_slice %29 {offsets = [0, 8], sizes = [16, 8], strides = [1, 1]} : vector<16x16xf32> to vector<16x8xf32>
    %46 = vector.shape_cast %44 : vector<16x8xf32> to vector<1x16x8xf32>
    %47 = vector.shape_cast %45 : vector<16x8xf32> to vector<1x16x8xf32>
    %48 = tpu.concatenate %46, %47 in 0 : vector<1x16x8xf32>, vector<1x16x8xf32> -> vector<2x16x8xf32>
    %49 = vector.extract_strided_slice %34 {offsets = [0, 0], sizes = [16, 8], strides = [1, 1]} : vector<16x16xf32> to vector<16x8xf32>
    %50 = vector.extract_strided_slice %34 {offsets = [0, 8], sizes = [16, 8], strides = [1, 1]} : vector<16x16xf32> to vector<16x8xf32>
    %51 = vector.shape_cast %49 : vector<16x8xf32> to vector<1x16x8xf32>
    %52 = vector.shape_cast %50 : vector<16x8xf32> to vector<1x16x8xf32>
    %53 = tpu.concatenate %51, %52 in 0 : vector<1x16x8xf32>, vector<1x16x8xf32> -> vector<2x16x8xf32>
    %54 = arith.mulf %43, %43 : vector<4x8x8xf32>
    %cst_27 = arith.constant dense<0.000000e+00> : vector<4x8xf32>
    %55 = vector.multi_reduction <add>, %54, %cst_27 [2] : vector<4x8x8xf32> to vector<4x8xf32>
    %56 = vector.shape_cast %55 : vector<4x8xf32> to vector<4x8x1xf32>
    %cst_28 = arith.constant 8.000000e+00 : f32
    %57 = vector.broadcast %cst_28 : f32 to vector<4x8x1xf32>
    %58 = arith.divf %56, %57 : vector<4x8x1xf32>
    %cst_29 = arith.constant 9.99999997E-7 : f32
    %59 = vector.broadcast %cst_29 : f32 to vector<4x8x1xf32>
    %60 = arith.addf %58, %59 : vector<4x8x1xf32>
    %61 = math.rsqrt %60 : vector<4x8x1xf32>
    %62 = vector.broadcast %61 : vector<4x8x1xf32> to vector<4x8x8xf32>
    %63 = arith.mulf %43, %62 : vector<4x8x8xf32>
    %c0_30 = arith.constant 0 : index
    %c0_31 = arith.constant 0 : index
    %c0_32 = arith.constant 0 : index
    %64 = vector.load %arg11[%c0_30, %c0_31, %c0_32] : memref<1x1x8xf32, #tpu.memory_space<vmem>>, vector<1x1x8xf32>
    %65 = vector.broadcast %64 : vector<1x1x8xf32> to vector<4x8x8xf32>
    %66 = arith.mulf %63, %65 : vector<4x8x8xf32>
    %67 = arith.mulf %48, %48 : vector<2x16x8xf32>
    %cst_33 = arith.constant dense<0.000000e+00> : vector<2x16xf32>
    %68 = vector.multi_reduction <add>, %67, %cst_33 [2] : vector<2x16x8xf32> to vector<2x16xf32>
    %69 = vector.shape_cast %68 : vector<2x16xf32> to vector<2x16x1xf32>
    %cst_34 = arith.constant 8.000000e+00 : f32
    %70 = vector.broadcast %cst_34 : f32 to vector<2x16x1xf32>
    %71 = arith.divf %69, %70 : vector<2x16x1xf32>
    %cst_35 = arith.constant 9.99999997E-7 : f32
    %72 = vector.broadcast %cst_35 : f32 to vector<2x16x1xf32>
    %73 = arith.addf %71, %72 : vector<2x16x1xf32>
    %74 = math.rsqrt %73 : vector<2x16x1xf32>
    %75 = vector.broadcast %74 : vector<2x16x1xf32> to vector<2x16x8xf32>
    %76 = arith.mulf %48, %75 : vector<2x16x8xf32>
    %c0_36 = arith.constant 0 : index
    %c0_37 = arith.constant 0 : index
    %c0_38 = arith.constant 0 : index
    %77 = vector.load %arg12[%c0_36, %c0_37, %c0_38] : memref<1x1x8xf32, #tpu.memory_space<vmem>>, vector<1x1x8xf32>
    %78 = vector.broadcast %77 : vector<1x1x8xf32> to vector<2x16x8xf32>
    %79 = arith.mulf %76, %78 : vector<2x16x8xf32>
    %80 = vector.shape_cast %79 : vector<2x16x8xf32> to vector<2x1x16x8xf32>
    %81 = vector.shape_cast %80 : vector<2x1x16x8xf32> to vector<2x1x16x8xf32>
    %82 = vector.broadcast %81 : vector<2x1x16x8xf32> to vector<2x2x16x8xf32>
    %83 = vector.shape_cast %82 : vector<2x2x16x8xf32> to vector<4x16x8xf32>
    %84 = vector.shape_cast %53 : vector<2x16x8xf32> to vector<2x1x16x8xf32>
    %85 = vector.shape_cast %84 : vector<2x1x16x8xf32> to vector<2x1x16x8xf32>
    %86 = vector.broadcast %85 : vector<2x1x16x8xf32> to vector<2x2x16x8xf32>
    %87 = vector.shape_cast %86 : vector<2x2x16x8xf32> to vector<4x16x8xf32>
    %88 = arith.truncf %66 : vector<4x8x8xf32> to vector<4x8x8xbf16>
    %89 = arith.truncf %83 : vector<4x16x8xf32> to vector<4x16x8xbf16>
    "tpu.trace_start"() <{level = 10 : i32, message = "hqd,hkd->hqk"}> : () -> ()
    %cst_39 = arith.constant dense<0.000000e+00> : vector<4x8x16xf32>
    %90 = tpu.matmul %88, %89, %cst_39 {dimension_numbers = #tpu.dot_dimension_numbers<[2], [2], [1], [1], [0, 0, 0, 1, 1, 1], [0], [0]>} : vector<4x8x8xbf16>, vector<4x16x8xbf16>, vector<4x8x16xf32> -> vector<4x8x16xf32>
    "tpu.trace_stop"() : () -> ()
    %91 = vector.broadcast %4 : vector<1x1x16xf32> to vector<4x8x16xf32>
    %92 = arith.addf %90, %91 : vector<4x8x16xf32>
    %cst_40 = arith.constant dense<0xFF800000> : vector<4x8xf32>
    %93 = vector.multi_reduction <maximumf>, %92, %cst_40 [2] : vector<4x8x16xf32> to vector<4x8xf32>
    %94 = vector.shape_cast %93 : vector<4x8xf32> to vector<4x8x1xf32>
    %95 = vector.broadcast %94 : vector<4x8x1xf32> to vector<4x8x16xf32>
    %96 = arith.subf %92, %95 : vector<4x8x16xf32>
    %97 = math.exp %96 : vector<4x8x16xf32>
    %cst_41 = arith.constant dense<0.000000e+00> : vector<4x8xf32>
    %98 = vector.multi_reduction <add>, %97, %cst_41 [2] : vector<4x8x16xf32> to vector<4x8xf32>
    %99 = vector.shape_cast %98 : vector<4x8xf32> to vector<4x8x1xf32>
    %100 = tpu.reciprocal %99 {approx = true} : vector<4x8x1xf32> -> vector<4x8x1xf32>
    %101 = vector.broadcast %100 : vector<4x8x1xf32> to vector<4x8x16xf32>
    %102 = arith.mulf %97, %101 : vector<4x8x16xf32>
    %103 = arith.truncf %102 : vector<4x8x16xf32> to vector<4x8x16xbf16>
    %104 = arith.truncf %87 : vector<4x16x8xf32> to vector<4x16x8xbf16>
    "tpu.trace_start"() <{level = 10 : i32, message = "hqk,hkd->hqd"}> : () -> ()
    %cst_42 = arith.constant dense<0.000000e+00> : vector<4x8x8xf32>
    %105 = tpu.matmul %103, %104, %cst_42 {dimension_numbers = #tpu.dot_dimension_numbers<[2], [1], [1], [2], [0, 0, 0, 1, 1, 2], [0], [0]>} : vector<4x8x16xbf16>, vector<4x16x8xbf16>, vector<4x8x8xf32> -> vector<4x8x8xf32>
    "tpu.trace_stop"() : () -> ()
    %106 = arith.truncf %105 : vector<4x8x8xf32> to vector<4x8x8xbf16>
    %c0_43 = arith.constant 0 : index
    %c0_44 = arith.constant 0 : index
    %c0_45 = arith.constant 0 : index
    %107 = vector.load %arg13[%c0_43, %c0_44, %c0_45] : memref<4x8x32xbf16, #tpu.memory_space<vmem>>, vector<4x8x32xbf16>
    "tpu.trace_start"() <{level = 10 : i32, message = "hqd,hde->hqe"}> : () -> ()
    %cst_46 = arith.constant dense<0.000000e+00> : vector<4x8x32xf32>
    %108 = tpu.matmul %106, %107, %cst_46 {dimension_numbers = #tpu.dot_dimension_numbers<[2], [1], [1], [2], [0, 0, 0, 1, 1, 2], [0], [0]>} : vector<4x8x8xbf16>, vector<4x8x32xbf16>, vector<4x8x32xf32> -> vector<4x8x32xf32>
    "tpu.trace_stop"() : () -> ()
    %cst_47 = arith.constant dense<0.000000e+00> : vector<8x32xf32>
    %109 = vector.multi_reduction <add>, %108, %cst_47 [0] : vector<4x8x32xf32> to vector<8x32xf32>
    %c0_48 = arith.constant 0 : index
    %c0_49 = arith.constant 0 : index
    %110 = vector.load %arg14[%c0_48, %c0_49] : memref<1x32xf32, #tpu.memory_space<vmem>>, vector<1x32xf32>
    %111 = vector.broadcast %110 : vector<1x32xf32> to vector<8x32xf32>
    %112 = arith.addf %109, %111 : vector<8x32xf32>
    %c0_50 = arith.constant 0 : index
    %c0_51 = arith.constant 0 : index
    %113 = vector.load %arg15[%c0_50, %c0_51] : memref<1x32xf32, #tpu.memory_space<vmem>>, vector<1x32xf32>
    %114 = vector.broadcast %113 : vector<1x32xf32> to vector<8x32xf32>
    %115 = arith.mulf %114, %112 : vector<8x32xf32>
    %116 = arith.addf %1, %115 : vector<8x32xf32>
    %c0_52 = arith.constant 0 : index
    %c0_53 = arith.constant 0 : index
    %c0_54 = arith.constant 0 : index
    %117 = vector.load %arg16[%c0_52, %c0_53, %c0_54] : memref<1x8x32xf32, #tpu.memory_space<vmem>>, vector<1x8x32xf32>
    %118 = vector.shape_cast %117 : vector<1x8x32xf32> to vector<8x32xf32>
    %119 = vector.shape_cast %116 : vector<8x32xf32> to vector<1x8x32xf32>
    tpu.vector_store %arg16[%c0_52, %c0_53, %c0_54], %119 {strides = array<i32>} : memref<1x8x32xf32, #tpu.memory_space<vmem>>, vector<1x8x32xf32>,
    return
  }
  func.func @transform_0(%arg0: i32) -> (i32, i32, i32) {
    %c0_i32 = arith.constant 0 : i32
    %c0_i32_0 = arith.constant 0 : i32
    %c0_i32_1 = arith.constant 0 : i32
    return %arg0, %c0_i32, %c0_i32_0 : i32, i32, i32
  }
  func.func @transform_1(%arg0: i32) -> (i32, i32, i32) {
    %c0_i32 = arith.constant 0 : i32
    %c0_i32_0 = arith.constant 0 : i32
    %c0_i32_1 = arith.constant 0 : i32
    return %arg0, %c0_i32, %c0_i32_0 : i32, i32, i32
  }
  func.func @transform_2(%arg0: i32) -> (i32, i32, i32) {
    %c0_i32 = arith.constant 0 : i32
    %c0_i32_0 = arith.constant 0 : i32
    %c0_i32_1 = arith.constant 0 : i32
    return %arg0, %c0_i32, %c0_i32_0 : i32, i32, i32
  }
  func.func @transform_3(%arg0: i32) -> (i32, i32) {
    %c0_i32 = arith.constant 0 : i32
    %c0_i32_0 = arith.constant 0 : i32
    %c0_i32_1 = arith.constant 0 : i32
    return %c0_i32, %c0_i32_0 : i32, i32
  }
  func.func @transform_4(%arg0: i32) -> (i32, i32) {
    %c0_i32 = arith.constant 0 : i32
    %c0_i32_0 = arith.constant 0 : i32
    %c0_i32_1 = arith.constant 0 : i32
    return %c0_i32, %c0_i32_0 : i32, i32
  }
  func.func @transform_5(%arg0: i32) -> (i32, i32) {
    %c0_i32 = arith.constant 0 : i32
    %c0_i32_0 = arith.constant 0 : i32
    %c0_i32_1 = arith.constant 0 : i32
    return %c0_i32, %c0_i32_0 : i32, i32
  }
  func.func @transform_6(%arg0: i32) -> (i32, i32) {
    %c0_i32 = arith.constant 0 : i32
    %c0_i32_0 = arith.constant 0 : i32
    %c0_i32_1 = arith.constant 0 : i32
    return %c0_i32, %c0_i32_0 : i32, i32
  }
  func.func @transform_7(%arg0: i32) -> (i32, i32) {
    %c0_i32 = arith.constant 0 : i32
    %c0_i32_0 = arith.constant 0 : i32
    %c0_i32_1 = arith.constant 0 : i32
    return %c0_i32, %c0_i32_0 : i32, i32
  }
  func.func @transform_8(%arg0: i32) -> (i32, i32) {
    %c0_i32 = arith.constant 0 : i32
    %c0_i32_0 = arith.constant 0 : i32
    %c0_i32_1 = arith.constant 0 : i32
    return %c0_i32, %c0_i32_0 : i32, i32
  }
  func.func @transform_9(%arg0: i32) -> (i32, i32) {
    %c0_i32 = arith.constant 0 : i32
    %c0_i32_0 = arith.constant 0 : i32
    %c0_i32_1 = arith.constant 0 : i32
    return %c0_i32, %c0_i32_0 : i32, i32
  }
  func.func @transform_10(%arg0: i32) -> (i32, i32, i32) {
    %c0_i32 = arith.constant 0 : i32
    %c0_i32_0 = arith.constant 0 : i32
    %c0_i32_1 = arith.constant 0 : i32
    %c0_i32_2 = arith.constant 0 : i32
    return %c0_i32, %c0_i32_0, %c0_i32_1 : i32, i32, i32
  }
  func.func @transform_11(%arg0: i32) -> (i32, i32, i32) {
    %c0_i32 = arith.constant 0 : i32
    %c0_i32_0 = arith.constant 0 : i32
    %c0_i32_1 = arith.constant 0 : i32
    %c0_i32_2 = arith.constant 0 : i32
    return %c0_i32, %c0_i32_0, %c0_i32_1 : i32, i32, i32
  }
  func.func @transform_12(%arg0: i32) -> (i32, i32, i32) {
    %c0_i32 = arith.constant 0 : i32
    %c0_i32_0 = arith.constant 0 : i32
    %c0_i32_1 = arith.constant 0 : i32
    %c0_i32_2 = arith.constant 0 : i32
    return %c0_i32, %c0_i32_0, %c0_i32_1 : i32, i32, i32
  }
  func.func @transform_13(%arg0: i32) -> (i32, i32) {
    %c0_i32 = arith.constant 0 : i32
    %c0_i32_0 = arith.constant 0 : i32
    %c0_i32_1 = arith.constant 0 : i32
    return %c0_i32, %c0_i32_0 : i32, i32
  }
  func.func @transform_14(%arg0: i32) -> (i32, i32) {
    %c0_i32 = arith.constant 0 : i32
    %c0_i32_0 = arith.constant 0 : i32
    %c0_i32_1 = arith.constant 0 : i32
    return %c0_i32, %c0_i32_0 : i32, i32
  }
  func.func @transform_15(%arg0: i32) -> (i32, i32, i32) {
    %c0_i32 = arith.constant 0 : i32
    %c0_i32_0 = arith.constant 0 : i32
    %c0_i32_1 = arith.constant 0 : i32
    return %arg0, %c0_i32, %c0_i32_0 : i32, i32, i32
  }
}

module attributes {stable_mosaic.version = 11 : i64} {
  func.func @_moe_kernel(%arg0: i32, %arg1: i32, %arg2: memref<16x32xf32, #tpu.memory_space<vmem>>, %arg3: memref<1x32xf32, #tpu.memory_space<vmem>>, %arg4: memref<32x4xbf16, #tpu.memory_space<vmem>>, %arg5: memref<1x32x128xbf16, #tpu.memory_space<vmem>>, %arg6: memref<1x32x128xbf16, #tpu.memory_space<vmem>>, %arg7: memref<1x128x32xbf16, #tpu.memory_space<vmem>>, %arg8: memref<1x32xf32, #tpu.memory_space<vmem>>, %arg9: memref<16x32xf32, #tpu.memory_space<vmem>>, %arg10: memref<16x4xf32, #tpu.memory_space<vmem>>, %arg11: memref<16x32xbf16, #tpu.memory_space<vmem>>, %arg12: memref<16x4xf32, #tpu.memory_space<vmem>>, %arg13: memref<16x32xf32, #tpu.memory_space<vmem>>) attributes {dimension_semantics = [#tpu.dimension_semantics<parallel>, #tpu.dimension_semantics<arbitrary>], iteration_bounds = array<i64: 1, 4>, scalar_prefetch = 0 : i64, scratch_operands = 3 : i64, tpu.core_type = #tpu.core_type<tc>, window_params = [{transform_indices = @transform_0, window_bounds = array<i64: 16, 32>}, {pipeline_mode = #tpu.pipeline_mode<synchronous>, transform_indices = @transform_1, window_bounds = array<i64: 1, 32>}, {pipeline_mode = #tpu.pipeline_mode<synchronous>, transform_indices = @transform_2, window_bounds = array<i64: 32, 4>}, {transform_indices = @transform_3, window_bounds = array<i64: 1, 32, 128>}, {transform_indices = @transform_4, window_bounds = array<i64: 1, 32, 128>}, {transform_indices = @transform_5, window_bounds = array<i64: 1, 128, 32>}, {pipeline_mode = #tpu.pipeline_mode<synchronous>, transform_indices = @transform_6, window_bounds = array<i64: 1, 32>}, {transform_indices = @transform_7, window_bounds = array<i64: 16, 32>}, {transform_indices = @transform_8, window_bounds = array<i64: 16, 4>}]} {
    %c0_i32 = arith.constant 0 : i32
    %0 = arith.cmpi eq, %arg1, %c0_i32 : i32
    %1 = arith.extui %0 : i1 to i32
    %c0_i32_0 = arith.constant 0 : i32
    %2 = arith.cmpi ne, %1, %c0_i32_0 : i32
    scf.if %2 {
      %c0_23 = arith.constant 0 : index
      %c0_24 = arith.constant 0 : index
      %37 = vector.load %arg2[%c0_23, %c0_24] : memref<16x32xf32, #tpu.memory_space<vmem>>, vector<16x32xf32>
      %c0_25 = arith.constant 0 : index
      %c0_26 = arith.constant 0 : index
      %38 = vector.load %arg3[%c0_25, %c0_26] : memref<1x32xf32, #tpu.memory_space<vmem>>, vector<1x32xf32>
      %39 = arith.mulf %37, %37 : vector<16x32xf32>
      %cst_27 = arith.constant dense<0.000000e+00> : vector<16xf32>
      %40 = vector.multi_reduction <add>, %39, %cst_27 [1] : vector<16x32xf32> to vector<16xf32>
      %41 = vector.shape_cast %40 : vector<16xf32> to vector<16x1xf32>
      %cst_28 = arith.constant 3.200000e+01 : f32
      %42 = vector.broadcast %cst_28 : f32 to vector<16x1xf32>
      %43 = arith.divf %41, %42 : vector<16x1xf32>
      %cst_29 = arith.constant 9.99999997E-7 : f32
      %44 = vector.broadcast %cst_29 : f32 to vector<16x1xf32>
      %45 = arith.addf %43, %44 : vector<16x1xf32>
      %46 = math.rsqrt %45 : vector<16x1xf32>
      %47 = vector.broadcast %46 : vector<16x1xf32> to vector<16x32xf32>
      %48 = arith.mulf %37, %47 : vector<16x32xf32>
      %49 = vector.broadcast %38 : vector<1x32xf32> to vector<16x32xf32>
      %50 = arith.mulf %48, %49 : vector<16x32xf32>
      %51 = arith.truncf %50 : vector<16x32xf32> to vector<16x32xbf16>
      %c0_30 = arith.constant 0 : index
      %c0_31 = arith.constant 0 : index
      %52 = vector.load %arg11[%c0_30, %c0_31] : memref<16x32xbf16, #tpu.memory_space<vmem>>, vector<16x32xbf16>
      tpu.vector_store %arg11[%c0_30, %c0_31], %51 {strides = array<i32>} : memref<16x32xbf16, #tpu.memory_space<vmem>>, vector<16x32xbf16>,
      %c0_32 = arith.constant 0 : index
      %c0_33 = arith.constant 0 : index
      %53 = vector.load %arg4[%c0_32, %c0_33] : memref<32x4xbf16, #tpu.memory_space<vmem>>, vector<32x4xbf16>
      %cst_34 = arith.constant dense<0.000000e+00> : vector<16x4xf32>
      %54 = tpu.matmul %51, %53, %cst_34 {dimension_numbers = #tpu.dot_dimension_numbers<[1], [0], [0], [1], [0, 0, 1, 1], [], []>} : vector<16x32xbf16>, vector<32x4xbf16>, vector<16x4xf32> -> vector<16x4xf32>
      %c0_35 = arith.constant 0 : index
      %c0_36 = arith.constant 0 : index
      %55 = vector.load %arg10[%c0_35, %c0_36] : memref<16x4xf32, #tpu.memory_space<vmem>>, vector<16x4xf32>
      tpu.vector_store %arg10[%c0_35, %c0_36], %54 {strides = array<i32>} : memref<16x4xf32, #tpu.memory_space<vmem>>, vector<16x4xf32>,
      %cst_37 = arith.constant dense<0xFF800000> : vector<16xf32>
      %56 = vector.multi_reduction <maximumf>, %54, %cst_37 [1] : vector<16x4xf32> to vector<16xf32>
      %57 = vector.shape_cast %56 : vector<16xf32> to vector<16x1xf32>
      %58 = vector.broadcast %57 : vector<16x1xf32> to vector<16x4xf32>
      %59 = arith.subf %54, %58 : vector<16x4xf32>
      %60 = math.exp %59 : vector<16x4xf32>
      %cst_38 = arith.constant dense<0.000000e+00> : vector<16xf32>
      %61 = vector.multi_reduction <add>, %60, %cst_38 [1] : vector<16x4xf32> to vector<16xf32>
      %62 = vector.shape_cast %61 : vector<16xf32> to vector<16x1xf32>
      %63 = tpu.reciprocal %62 {approx = true} : vector<16x1xf32> -> vector<16x1xf32>
      %64 = vector.broadcast %63 : vector<16x1xf32> to vector<16x4xf32>
      %65 = arith.mulf %60, %64 : vector<16x4xf32>
      %66 = tpu.iota {dimensions = array<i32: 1>} : vector<16x4xi32>
      %false = arith.constant false
      %67 = vector.broadcast %false : i1 to vector<16x4xi1>
      %cst_39 = arith.constant dense<0xFF800000> : vector<16xf32>
      %68 = vector.multi_reduction <maximumf>, %65, %cst_39 [1] : vector<16x4xf32> to vector<16xf32>
      %69 = vector.shape_cast %68 : vector<16xf32> to vector<16x1xf32>
      %70 = vector.broadcast %69 : vector<16x1xf32> to vector<16x4xf32>
      %71 = arith.cmpf oge, %65, %70 : vector<16x4xf32>
      %c4_i32 = arith.constant 4 : i32
      %72 = vector.broadcast %c4_i32 : i32 to vector<16x4xi32>
      %73 = arith.select %71, %66, %72 : vector<16x4xi1>, vector<16x4xi32>
      %cst_40 = arith.constant dense<2147483647> : vector<16xi32>
      %74 = vector.multi_reduction <minsi>, %73, %cst_40 [1] : vector<16x4xi32> to vector<16xi32>
      %75 = vector.shape_cast %74 : vector<16xi32> to vector<16x1xi32>
      %76 = vector.broadcast %75 : vector<16x1xi32> to vector<16x4xi32>
      %77 = arith.cmpi eq, %66, %76 : vector<16x4xi32>
      %78 = arith.ori %67, %77 : vector<16x4xi1>
      %cst_41 = arith.constant -1.000000e+00 : f32
      %79 = vector.broadcast %cst_41 : f32 to vector<16x4xf32>
      %80 = arith.select %77, %79, %65 : vector<16x4xi1>, vector<16x4xf32>
      %cst_42 = arith.constant dense<0xFF800000> : vector<16xf32>
      %81 = vector.multi_reduction <maximumf>, %80, %cst_42 [1] : vector<16x4xf32> to vector<16xf32>
      %82 = vector.shape_cast %81 : vector<16xf32> to vector<16x1xf32>
      %83 = vector.broadcast %82 : vector<16x1xf32> to vector<16x4xf32>
      %84 = arith.cmpf oge, %80, %83 : vector<16x4xf32>
      %c4_i32_43 = arith.constant 4 : i32
      %85 = vector.broadcast %c4_i32_43 : i32 to vector<16x4xi32>
      %86 = arith.select %84, %66, %85 : vector<16x4xi1>, vector<16x4xi32>
      %cst_44 = arith.constant dense<2147483647> : vector<16xi32>
      %87 = vector.multi_reduction <minsi>, %86, %cst_44 [1] : vector<16x4xi32> to vector<16xi32>
      %88 = vector.shape_cast %87 : vector<16xi32> to vector<16x1xi32>
      %89 = vector.broadcast %88 : vector<16x1xi32> to vector<16x4xi32>
      %90 = arith.cmpi eq, %66, %89 : vector<16x4xi32>
      %91 = arith.ori %78, %90 : vector<16x4xi1>
      %cst_45 = arith.constant 0.000000e+00 : f32
      %92 = vector.broadcast %cst_45 : f32 to vector<16x4xf32>
      %93 = arith.select %91, %65, %92 : vector<16x4xi1>, vector<16x4xf32>
      %cst_46 = arith.constant dense<0.000000e+00> : vector<16xf32>
      %94 = vector.multi_reduction <add>, %93, %cst_46 [1] : vector<16x4xf32> to vector<16xf32>
      %95 = vector.shape_cast %94 : vector<16xf32> to vector<16x1xf32>
      %96 = tpu.reciprocal %95 {approx = true} : vector<16x1xf32> -> vector<16x1xf32>
      %97 = vector.broadcast %96 : vector<16x1xf32> to vector<16x4xf32>
      %98 = arith.mulf %93, %97 : vector<16x4xf32>
      %c0_47 = arith.constant 0 : index
      %c0_48 = arith.constant 0 : index
      %99 = vector.load %arg12[%c0_47, %c0_48] : memref<16x4xf32, #tpu.memory_space<vmem>>, vector<16x4xf32>
      tpu.vector_store %arg12[%c0_47, %c0_48], %98 {strides = array<i32>} : memref<16x4xf32, #tpu.memory_space<vmem>>, vector<16x4xf32>,
      %cst_49 = arith.constant 0.000000e+00 : f32
      %100 = vector.broadcast %cst_49 : f32 to vector<16x32xf32>
      %c0_50 = arith.constant 0 : index
      %c0_51 = arith.constant 0 : index
      %101 = vector.load %arg13[%c0_50, %c0_51] : memref<16x32xf32, #tpu.memory_space<vmem>>, vector<16x32xf32>
      tpu.vector_store %arg13[%c0_50, %c0_51], %100 {strides = array<i32>} : memref<16x32xf32, #tpu.memory_space<vmem>>, vector<16x32xf32>,
    } else {
    }
    %c0 = arith.constant 0 : index
    %c0_1 = arith.constant 0 : index
    %3 = vector.load %arg11[%c0, %c0_1] : memref<16x32xbf16, #tpu.memory_space<vmem>>, vector<16x32xbf16>
    %c0_2 = arith.constant 0 : index
    %c0_3 = arith.constant 0 : index
    %c0_4 = arith.constant 0 : index
    %4 = vector.load %arg5[%c0_2, %c0_3, %c0_4] : memref<1x32x128xbf16, #tpu.memory_space<vmem>>, vector<1x32x128xbf16>
    %5 = vector.shape_cast %4 : vector<1x32x128xbf16> to vector<32x128xbf16>
    %cst = arith.constant dense<0.000000e+00> : vector<16x128xf32>
    %6 = tpu.matmul %3, %5, %cst {dimension_numbers = #tpu.dot_dimension_numbers<[1], [0], [0], [1], [0, 0, 1, 1], [], []>} : vector<16x32xbf16>, vector<32x128xbf16>, vector<16x128xf32> -> vector<16x128xf32>
    %c0_5 = arith.constant 0 : index
    %c0_6 = arith.constant 0 : index
    %c0_7 = arith.constant 0 : index
    %7 = vector.load %arg6[%c0_5, %c0_6, %c0_7] : memref<1x32x128xbf16, #tpu.memory_space<vmem>>, vector<1x32x128xbf16>
    %8 = vector.shape_cast %7 : vector<1x32x128xbf16> to vector<32x128xbf16>
    %cst_8 = arith.constant dense<0.000000e+00> : vector<16x128xf32>
    %9 = tpu.matmul %3, %8, %cst_8 {dimension_numbers = #tpu.dot_dimension_numbers<[1], [0], [0], [1], [0, 0, 1, 1], [], []>} : vector<16x32xbf16>, vector<32x128xbf16>, vector<16x128xf32> -> vector<16x128xf32>
    %10 = arith.negf %6 : vector<16x128xf32>
    %11 = math.exp %10 : vector<16x128xf32>
    %cst_9 = arith.constant 1.000000e+00 : f32
    %12 = vector.broadcast %cst_9 : f32 to vector<16x128xf32>
    %13 = arith.addf %12, %11 : vector<16x128xf32>
    %14 = arith.divf %12, %13 : vector<16x128xf32>
    %15 = arith.mulf %6, %14 : vector<16x128xf32>
    %16 = arith.mulf %15, %9 : vector<16x128xf32>
    %17 = arith.truncf %16 : vector<16x128xf32> to vector<16x128xbf16>
    %c0_10 = arith.constant 0 : index
    %c0_11 = arith.constant 0 : index
    %c0_12 = arith.constant 0 : index
    %18 = vector.load %arg7[%c0_10, %c0_11, %c0_12] : memref<1x128x32xbf16, #tpu.memory_space<vmem>>, vector<1x128x32xbf16>
    %19 = vector.shape_cast %18 : vector<1x128x32xbf16> to vector<128x32xbf16>
    %cst_13 = arith.constant dense<0.000000e+00> : vector<16x32xf32>
    %20 = tpu.matmul %17, %19, %cst_13 {dimension_numbers = #tpu.dot_dimension_numbers<[1], [0], [0], [1], [0, 0, 1, 1], [], []>} : vector<16x128xbf16>, vector<128x32xbf16>, vector<16x32xf32> -> vector<16x32xf32>
    %21 = tpu.iota {dimensions = array<i32: 1>} : vector<16x4xi32>
    %22 = vector.broadcast %arg1 : i32 to vector<16x4xi32>
    %23 = arith.cmpi eq, %21, %22 : vector<16x4xi32>
    %c0_14 = arith.constant 0 : index
    %c0_15 = arith.constant 0 : index
    %24 = vector.load %arg12[%c0_14, %c0_15] : memref<16x4xf32, #tpu.memory_space<vmem>>, vector<16x4xf32>
    %cst_16 = arith.constant 0.000000e+00 : f32
    %25 = vector.broadcast %cst_16 : f32 to vector<16x4xf32>
    %26 = arith.select %23, %24, %25 : vector<16x4xi1>, vector<16x4xf32>
    %cst_17 = arith.constant dense<0.000000e+00> : vector<16xf32>
    %27 = vector.multi_reduction <add>, %26, %cst_17 [1] : vector<16x4xf32> to vector<16xf32>
    %28 = vector.shape_cast %27 : vector<16xf32> to vector<16x1xf32>
    %c0_18 = arith.constant 0 : index
    %c0_19 = arith.constant 0 : index
    %29 = vector.load %arg13[%c0_18, %c0_19] : memref<16x32xf32, #tpu.memory_space<vmem>>, vector<16x32xf32>
    %30 = vector.broadcast %28 : vector<16x1xf32> to vector<16x32xf32>
    %31 = arith.mulf %30, %20 : vector<16x32xf32>
    %32 = arith.addf %29, %31 : vector<16x32xf32>
    %c0_20 = arith.constant 0 : index
    %c0_21 = arith.constant 0 : index
    %33 = vector.load %arg13[%c0_20, %c0_21] : memref<16x32xf32, #tpu.memory_space<vmem>>, vector<16x32xf32>
    tpu.vector_store %arg13[%c0_20, %c0_21], %32 {strides = array<i32>} : memref<16x32xf32, #tpu.memory_space<vmem>>, vector<16x32xf32>,
    %c3_i32 = arith.constant 3 : i32
    %34 = arith.cmpi eq, %arg1, %c3_i32 : i32
    %35 = arith.extui %34 : i1 to i32
    %c0_i32_22 = arith.constant 0 : i32
    %36 = arith.cmpi ne, %35, %c0_i32_22 : i32
    scf.if %36 {
      %c0_23 = arith.constant 0 : index
      %c0_24 = arith.constant 0 : index
      %37 = vector.load %arg2[%c0_23, %c0_24] : memref<16x32xf32, #tpu.memory_space<vmem>>, vector<16x32xf32>
      %c0_25 = arith.constant 0 : index
      %c0_26 = arith.constant 0 : index
      %38 = vector.load %arg8[%c0_25, %c0_26] : memref<1x32xf32, #tpu.memory_space<vmem>>, vector<1x32xf32>
      %c0_27 = arith.constant 0 : index
      %c0_28 = arith.constant 0 : index
      %39 = vector.load %arg13[%c0_27, %c0_28] : memref<16x32xf32, #tpu.memory_space<vmem>>, vector<16x32xf32>
      %40 = vector.broadcast %38 : vector<1x32xf32> to vector<16x32xf32>
      %41 = arith.mulf %40, %39 : vector<16x32xf32>
      %42 = arith.addf %37, %41 : vector<16x32xf32>
      %c0_29 = arith.constant 0 : index
      %c0_30 = arith.constant 0 : index
      %43 = vector.load %arg9[%c0_29, %c0_30] : memref<16x32xf32, #tpu.memory_space<vmem>>, vector<16x32xf32>
      tpu.vector_store %arg9[%c0_29, %c0_30], %42 {strides = array<i32>} : memref<16x32xf32, #tpu.memory_space<vmem>>, vector<16x32xf32>,
    } else {
    }
    return
  }
  func.func @transform_0(%arg0: i32, %arg1: i32) -> (i32, i32) {
    %c0_i32 = arith.constant 0 : i32
    %c0_i32_0 = arith.constant 0 : i32
    return %arg0, %c0_i32 : i32, i32
  }
  func.func @transform_1(%arg0: i32, %arg1: i32) -> (i32, i32) {
    %c0_i32 = arith.constant 0 : i32
    %c0_i32_0 = arith.constant 0 : i32
    %c0_i32_1 = arith.constant 0 : i32
    return %c0_i32, %c0_i32_0 : i32, i32
  }
  func.func @transform_2(%arg0: i32, %arg1: i32) -> (i32, i32) {
    %c0_i32 = arith.constant 0 : i32
    %c0_i32_0 = arith.constant 0 : i32
    %c0_i32_1 = arith.constant 0 : i32
    return %c0_i32, %c0_i32_0 : i32, i32
  }
  func.func @transform_3(%arg0: i32, %arg1: i32) -> (i32, i32, i32) {
    %c0_i32 = arith.constant 0 : i32
    %c0_i32_0 = arith.constant 0 : i32
    %c0_i32_1 = arith.constant 0 : i32
    return %arg1, %c0_i32, %c0_i32_0 : i32, i32, i32
  }
  func.func @transform_4(%arg0: i32, %arg1: i32) -> (i32, i32, i32) {
    %c0_i32 = arith.constant 0 : i32
    %c0_i32_0 = arith.constant 0 : i32
    %c0_i32_1 = arith.constant 0 : i32
    return %arg1, %c0_i32, %c0_i32_0 : i32, i32, i32
  }
  func.func @transform_5(%arg0: i32, %arg1: i32) -> (i32, i32, i32) {
    %c0_i32 = arith.constant 0 : i32
    %c0_i32_0 = arith.constant 0 : i32
    %c0_i32_1 = arith.constant 0 : i32
    return %arg1, %c0_i32, %c0_i32_0 : i32, i32, i32
  }
  func.func @transform_6(%arg0: i32, %arg1: i32) -> (i32, i32) {
    %c0_i32 = arith.constant 0 : i32
    %c0_i32_0 = arith.constant 0 : i32
    %c0_i32_1 = arith.constant 0 : i32
    return %c0_i32, %c0_i32_0 : i32, i32
  }
  func.func @transform_7(%arg0: i32, %arg1: i32) -> (i32, i32) {
    %c0_i32 = arith.constant 0 : i32
    %c0_i32_0 = arith.constant 0 : i32
    return %arg0, %c0_i32 : i32, i32
  }
  func.func @transform_8(%arg0: i32, %arg1: i32) -> (i32, i32) {
    %c0_i32 = arith.constant 0 : i32
    %c0_i32_0 = arith.constant 0 : i32
    return %arg0, %c0_i32 : i32, i32
  }
}

</mosaic_0001>

<bundles_post_ra>
// kernel: cross_modal_decoder_layer.3
= control target key start
LH: loop header
LB: loop body
LE: loop exit
PB: predicated region body
PF: predicated region fallthrough
CT: control target
= control target key end

     0   :  { %s1283_s27 = smov 0   ;;  %s1285_s28 = smov 0   ;;  %s1440_s0 = inlined_call_operand.vmem [shape: f32[16,32], index: 0, kind: input, shape index: {}, may-alias: {0,7}]   ;;  %s1441_s1 = inlined_call_operand.vmem [shape: f32[1,32], index: 1, kind: input, shape index: {}]   ;;  %s1442_s2 = inlined_call_operand.vmem [shape: bf16[32,4], index: 2, kind: input, shape index: {}]   ;;  %s1443_s3 = inlined_call_operand.vmem [shape: bf16[4,32,128], index: 3, kind: input, shape index: {}]   ;;  %s1444_s4 = inlined_call_operand.vmem [shape: bf16[4,32,128], index: 4, kind: input, shape index: {}]   ;;  %s1445_s5 = inlined_call_operand.vmem [shape: bf16[4,128,32], index: 5, kind: input, shape index: {}]   ;;  %s1446_s6 = inlined_call_operand.vmem [shape: f32[1,32], index: 6, kind: input, shape index: {}]   ;;  %s1447_s7 = inlined_call_operand.vmem [shape: f32[16,32], index: 7, kind: output, shape index: {0}, may-alias: {0,7}]   ;;  %s1448_s8 = inlined_call_operand.vmem [shape: f32[16,4], index: 8, kind: output, shape index: {1}]  }
   0x1   :  { %s1287_s29 = smov 0  }
   0x2 LB: > { %s28_s30 = sadd.s32 1, %s1228_s28  ;;  %p1043_p0 = scmp.ge.s32.totalorder %s1232_s29, 1  ;;  %s1232_s29 = sphi %s1287_s29, %s19_s29   ;;  %s1228_s28 = sphi %s1285_s28, %s1450_s28   ;;  %s1224_s27 = sphi %s1283_s27, %s1449_s27  }
   0x3   : > { %p29_p1 = scmp.ge.s32.totalorder %s28_s30, 4  ;;  %p308_p2 = scmp.lt.s32.totalorder %s1232_s29, 5 }
   0x5   : > { %s1452_s30 = smov (%p29_p1, %s28_s30), 0  ;;  %p309_p3 = pnand %p1043_p0, %p308_p2 }
   0x6   : > { %p368_p4 = scmp.lt.s32.totalorder (!%p309_p3), %s1224_s27, 3  ;;  %p1050_p5 = scmp.ne.s32.totalorder (!%p309_p3), %s1224_s27, 0 }
   0x7   : > { %312 = sbr.rel (%p309_p3) target bundleno = 2244 (0x8c4), region = 48 }
   0xe   : > { %s369_s9 = scalar_select %p368_p4, %s1224_s27, 3 }
   0xf   : > { %399 = sbr.rel (%p1050_p5) target bundleno = 1758 (0x6de), region = 52  ;;  %v400_v0 = vld [vmem:[%s1440_s0] sm:$0xff] (!%p1050_p5)  ;;  %vm405_vm0 = vcmask (!%p1050_p5), 261120   ;;  %v401_v1 = vld [vmem:[%s1440_s0 + $0x8] sm:$0xff] (!%p1050_p5)  ;;  %v1234_v7 = vmov (!%p1050_p5), 0.0   ;;  %vm1235_vm1 = vmmov (!%p1050_p5), 0   ;;  %v516_v47 = vlaneseq (!%p1050_p5) }
  0x10   : > { %s1079_s10 = sshll.u32 %s369_s9, 4  ;;  %s1081_s11 = sshll.u32 %s369_s9, 6  ;;  %v403_v2 = vmul.f32 (!%p1050_p5), %v400_v0, %v400_v0  ;;  %v404_v3 = vmul.f32 (!%p1050_p5), %v401_v1, %v401_v1  ;;  %v1172_v6 = vld [vmem:[%s1442_s2] sm:$0xff] (!%p1050_p5)   ;;  %1100 = vmatprep.subr.bf16.mxu0 (!%p1050_p5), %v1234_v7  ;;  %620 = vst.msk [vmem:[#allocation4] sm:$0xff] (!%p1050_p5), %vm405_vm0, %v1234_v7  ;;  %621 = vst.msk [vmem:[#allocation4 + $0x8] sm:$0xff] (!%p1050_p5), %vm405_vm0, %v1234_v7  ;;  %1104 = vmatprep.mubr.msk.bf16.mxu0 (!%p1050_p5), %vm1235_vm1, %v1234_v7  ;;  %v1173_v8 = vld [vmem:[%s1442_s2 + $0x8] sm:$0xff] (!%p1050_p5)  }
  0x11   : > { %s1308_s14 = scalar_lea.vmem %s1443_s3, %s1079_s10  ;;  %s1313_s17 = scalar_lea.vmem %s1444_s4, %s1079_s10  ;;  %1101 = vmatpush3.bf16.msra.mxu0 (!%p1050_p5), %v1172_v6  ;;  %v1051_v18 = vld [vmem:[%s1441_s1] ss:$0 sm:$0xff] (!%p1050_p5)  ;;  %vm491_vm2 = vcmask (!%p1050_p5), 31744   ;;  %v1362_v48 = vand.u32 (!%p1050_p5), 127, %v516_v47 }
  0x12   : > { %s1318_s20 = scalar_lea.vmem %s1445_s5, %s1081_s11  ;;  %v406_v4 = vsel (!%p1050_p5), %vm405_vm0, %v403_v2, 0.0  ;;  %v409_v5 = vsel (!%p1050_p5), %vm405_vm0, %v404_v3, 0.0  ;;  %1102 = vmatprep.subr.bf16.mxu0 (!%p1050_p5), %v1234_v7 }
  0x13   : > { %407 = vadd.xlane.f32.xlu0 (!%p1050_p5), %v406_v4 }
  0x15   : > { %1103 = vmatpush3.bf16.msra.mxu0 (!%p1050_p5), %v1173_v8 }
  0x17   : > { %410 = vadd.xlane.f32.xlu0 %v409_v5 }
  0xa0   : > { %v408_v9 = vpop.xlane.xlu0 %407 }
  0xa1   : > { %v413_v10 = vmul.f32 0.03125, %v408_v9 }
  0xa3   : > { %v415_v11 = vadd.f32 1e-06, %v413_v10 }
  0xa4   : > { %v411_v12 = vpop.xlane.xlu0 %410 }
  0xa5   : > { %1174 = vrsqrt.f32 %v415_v11  ;;  %v414_v13 = vmul.f32 0.03125, %v411_v12 }
  0xa7   : > { %v416_v14 = vadd.f32 1e-06, %v414_v13 }
  0xa9   : > { %1176 = vrsqrt.f32 %v416_v14 }
  0xaf   : > { %v1175_v15 = vpop.eup %1174 }
  0xb0   : > { %v419_v16 = vmul.f32 %v1175_v15, %v400_v0 }
  0xb2   : > { %v427_v20 = vmul.f32 %v1051_v18, %v419_v16 }
  0xb3   : > { %v1177_v17 = vpop.eup %1176 }
  0xb4   : > { %v420_v19 = vmul.f32 %v1177_v17, %v401_v1 }
  0xb6   : > { %v428_v21 = vmul.f32 %v1051_v18, %v420_v19 }
  0xb8   : > { %v429_v22 = vpack.c.bf16 %v428_v21, %v427_v20 }
  0xba   : > { %430 = vst.msk [vmem:[#allocation2] sm:$0xff] %vm405_vm0, %v429_v22  ;;  %1105 = vmatmul.mubr.msk.bf16.vlgmr.msra.gmra.mrb[0].mxu0 %vm405_vm0, %v429_v22 }
 0x18d   : > { %v484_v23 = vpop.f32.mrb[0].mxu0 }
 0x18e   : > { %492 = vst.msk [vmem:[%s1448_s8] sm:$0xff] %vm491_vm2, %v484_v23  ;;  %v1106_v24 = vpop.f32.mrb[1].mxu0  ;;  %v494_v25 = vsel %vm491_vm2, %v484_v23, -inf }
 0x18f   : > { %495 = vmax.xlane.f32.xlu1 %v494_v25  ;;  %v487_v26 = vpop.f32.mrb[2].mxu0 }
 0x190   : > { %493 = vst.msk [vmem:[%s1448_s8 + $0x8] sm:$0xff] %vm491_vm2, %v487_v26  ;;  %v1107_v27 = vpop.f32.mrb[3].mxu0  ;;  %v497_v28 = vsel %vm491_vm2, %v487_v26, -inf }
 0x193   : > { %498 = vmax.xlane.f32.xlu1 %v497_v28 }
 0x21c   : > { %v496_v29 = vpop.xlane.xlu1 %495 }
 0x21d   : > { %v500_v30 = vsub.f32 %v484_v23, %v496_v29 }
 0x21f   : > { %v502_v31 = vmul.f32 1.442695, %v500_v30 }
 0x220   : > { %v499_v32 = vpop.xlane.xlu1 %498 }
 0x221   : > { %1178 = vpow2.f32 %v502_v31  ;;  %v501_v33 = vsub.f32 %v487_v26, %v499_v32 }
 0x223   : > { %v504_v34 = vmul.f32 1.442695, %v501_v33 }
 0x225   : > { %1180 = vpow2.f32 %v504_v34 }
 0x22b   : > { %v1179_v35 = vpop.eup %1178 }
 0x22c   : > { %v506_v36 = vsel %vm491_vm2, %v1179_v35, 0.0 }
 0x22d   : > { %507 = vadd.xlane.f32.xlu0 %v506_v36 }
 0x22f   : > { %v1181_v37 = vpop.eup %1180 }
 0x230   : > { %v509_v38 = vsel %vm491_vm2, %v1181_v37, 0.0 }
 0x231   : > { %510 = vadd.xlane.f32.xlu1 %v509_v38 }
 0x2ba   : > { %v508_v39 = vpop.xlane.xlu0 %507 }
 0x2bb   : > { %1182 = vrcp.f32 %v508_v39 }
 0x2be   : > { %v511_v40 = vpop.xlane.xlu1 %510 }
 0x2bf   : > { %1184 = vrcp.f32 %v511_v40 }
 0x2c5   : > { %v1183_v41 = vpop.eup %1182 }
 0x2c6   : > { %v1354_v42 = vmul.f32 %v1183_v41, %v1179_v35 }
 0x2c8   : > { %v518_v43 = vsel %vm491_vm2, %v1354_v42, -inf }
 0x2c9   : > { %v1185_v44 = vpop.eup %1184  ;;  %519 = vmax.xlane.f32.xlu0 %v518_v43 }
 0x2ca   : > { %v1358_v45 = vmul.f32 %v1185_v44, %v1181_v37 }
 0x2cc   : > { %v521_v46 = vsel %vm491_vm2, %v1358_v45, -inf }
 0x2cd   : > { %522 = vmax.xlane.f32.xlu1 %v521_v46 }
 0x356   : > { %v520_v49 = vpop.xlane.xlu0 %519 }
 0x357   : > { %vm524_vm3 = vcmp.ge.f32.partialorder %v1354_v42, %v520_v49 }
 0x358   : > { %v526_v50 = vsel %vm524_vm3, %v1362_v48, 4 }
 0x359   : > { %v528_v51 = vsel %vm491_vm2, %v526_v50, 2147483647 }
 0x35a   : > { %v523_v52 = vpop.xlane.xlu1 %522  ;;  %v530_v53 = vshra.s32 %v528_v51, 16  ;;  %v529_v59 = vand.u32 65535, %v528_v51 }
 0x35b   : > { %vm525_vm4 = vcmp.ge.f32.partialorder %v1358_v45, %v523_v52 }
 0x35c   : > { %v527_v54 = vsel %vm525_vm4, %v1362_v48, 4  ;;  %v532_v55 = vcvt.s32.f32 %v530_v53  ;;  %v531_v61 = vcvt.s32.f32 %v529_v59 }
 0x35d   : > { %v543_v56 = vsel %vm491_vm2, %v527_v54, 2147483647 }
 0x35e   : > { %533 = vmin.xlane.f32.xlu0 %v532_v55  ;;  %v545_v57 = vshra.s32 %v543_v56, 16  ;;  %v544_v62 = vand.u32 65535, %v543_v56 }
 0x360   : > { %v547_v58 = vcvt.s32.f32 %v545_v57  ;;  %v546_v1 = vcvt.s32.f32 %v544_v62 }
 0x362   : > { %548 = vmin.xlane.f32.xlu1 %v547_v58 }
 0x3eb   : > { %v534_v60 = vpop.xlane.xlu0 %533 }
 0x3ec   : > { %vm535_vm5 = vcmp.eq.f32.partialorder %v532_v55, %v534_v60  ;;  %v540_v3 = vcvt.f32.s32 %v534_v60 }
 0x3ed   : > { %v536_v63 = vsel %vm535_vm5, %v531_v61, inf }
 0x3ee   : > { %537 = vmin.xlane.f32.xlu0 %v536_v63  ;;  %v541_v5 = vshll.u32 %v540_v3, 16 }
 0x3ef   : > { %v549_v0 = vpop.xlane.xlu1 %548 }
 0x3f0   : > { %vm550_vm6 = vcmp.eq.f32.partialorder %v547_v58, %v549_v0  ;;  %v555_v6 = vcvt.f32.s32 %v549_v0 }
 0x3f1   : > { %v551_v2 = vsel %vm550_vm6, %v546_v1, inf }
 0x3f2   : > { %552 = vmin.xlane.f32.xlu1 %v551_v2  ;;  %v556_v10 = vshll.u32 %v555_v6, 16 }
 0x47b   : > { %v538_v4 = vpop.xlane.xlu0 %537 }
 0x47c   : > { %v539_v7 = vcvt.f32.s32 %v538_v4 }
 0x47e   : > { %v542_v8 = vadd.s32 %v541_v5, %v539_v7 }
 0x47f   : > { %v553_v9 = vpop.xlane.xlu1 %552 }
 0x480   : > { %v554_v11 = vcvt.f32.s32 %v553_v9  ;;  %vm558_vm7 = vcmp.eq.s32.totalorder %v1362_v48, %v542_v8 }
 0x481   : > { %v560_v12 = vsel %vm558_vm7, -1.0, %v1354_v42 }
 0x482   : > { %v557_v13 = vadd.s32 %v556_v10, %v554_v11  ;;  %v562_v14 = vsel %vm491_vm2, %v560_v12, -inf }
 0x483   : > { %563 = vmax.xlane.f32.xlu0 %v562_v14 }
 0x484   : > { %vm559_vm8 = vcmp.eq.s32.totalorder %v1362_v48, %v557_v13 }
 0x485   : > { %v561_v15 = vsel %vm559_vm8, -1.0, %v1358_v45 }
 0x486   : > { %v565_v16 = vsel %vm491_vm2, %v561_v15, -inf }
 0x487   : > { %566 = vmax.xlane.f32.xlu1 %v565_v16 }
 0x510   : > { %v564_v17 = vpop.xlane.xlu0 %563 }
 0x511   : > { %vm568_vm9 = vcmp.ge.f32.partialorder %v560_v12, %v564_v17 }
 0x512   : > { %v570_v18 = vsel %vm568_vm9, %v1362_v48, 4 }
 0x513   : > { %v572_v19 = vsel %vm491_vm2, %v570_v18, 2147483647 }
 0x514   : > { %v567_v20 = vpop.xlane.xlu1 %566  ;;  %v574_v21 = vshra.s32 %v572_v19, 16  ;;  %v573_v27 = vand.u32 65535, %v572_v19 }
 0x515   : > { %vm569_vm10 = vcmp.ge.f32.partialorder %v561_v15, %v567_v20 }
 0x516   : > { %v571_v22 = vsel %vm569_vm10, %v1362_v48, 4  ;;  %v576_v23 = vcvt.s32.f32 %v574_v21  ;;  %v575_v29 = vcvt.s32.f32 %v573_v27 }
 0x517   : > { %v587_v24 = vsel %vm491_vm2, %v571_v22, 2147483647 }
 0x518   : > { %577 = vmin.xlane.f32.xlu0 %v576_v23  ;;  %v589_v25 = vshra.s32 %v587_v24, 16  ;;  %v588_v30 = vand.u32 65535, %v587_v24 }
 0x51a   : > { %v591_v26 = vcvt.s32.f32 %v589_v25  ;;  %v590_v33 = vcvt.s32.f32 %v588_v30 }
 0x51c   : > { %592 = vmin.xlane.f32.xlu1 %v591_v26 }
 0x5a5   : > { %v578_v28 = vpop.xlane.xlu0 %577 }
 0x5a6   : > { %vm579_vm11 = vcmp.eq.f32.partialorder %v576_v23, %v578_v28  ;;  %v584_v35 = vcvt.f32.s32 %v578_v28 }
 0x5a7   : > { %v580_v31 = vsel %vm579_vm11, %v575_v29, inf }
 0x5a8   : > { %581 = vmin.xlane.f32.xlu0 %v580_v31  ;;  %v585_v37 = vshll.u32 %v584_v35, 16 }
 0x5a9   : > { %v593_v32 = vpop.xlane.xlu1 %592 }
 0x5aa   : > { %vm594_vm12 = vcmp.eq.f32.partialorder %v591_v26, %v593_v32  ;;  %v599_v38 = vcvt.f32.s32 %v593_v32 }
 0x5ab   : > { %v595_v34 = vsel %vm594_vm12, %v590_v33, inf }
 0x5ac   : > { %596 = vmin.xlane.f32.xlu1 %v595_v34  ;;  %v600_v43 = vshll.u32 %v599_v38, 16 }
 0x635   : > { %v582_v36 = vpop.xlane.xlu0 %581 }
 0x636   : > { %v583_v39 = vcvt.f32.s32 %v582_v36 }
 0x638   : > { %v586_v40 = vadd.s32 %v585_v37, %v583_v39 }
 0x639   : > { %v597_v41 = vpop.xlane.xlu1 %596 }
 0x63a   : > { %v598_v44 = vcvt.f32.s32 %v597_v41  ;;  %vm602_vm13 = vcmp.eq.s32.totalorder %v1362_v48, %v586_v40 }
 0x63b   : > { %vm604_vm14 = vmor %vm558_vm7, %vm602_vm13 }
 0x63c   : > { %v601_v46 = vadd.s32 %v600_v43, %v598_v44  ;;  %v606_v47 = vsel %vm604_vm14, %v1354_v42, 0.0 }
 0x63d   : > { %v608_v49 = vsel %vm491_vm2, %v606_v47, 0.0 }
 0x63e   : > { %609 = vadd.xlane.f32.xlu0 %v608_v49  ;;  %vm603_vm15 = vcmp.eq.s32.totalorder %v1362_v48, %v601_v46 }
 0x63f   : > { %vm605_vm0 = vmor %vm559_vm8, %vm603_vm15 }
 0x640   : > { %v607_v50 = vsel %vm605_vm0, %v1358_v45, 0.0 }
 0x641   : > { %v611_v51 = vsel %vm491_vm2, %v607_v50, 0.0 }
 0x642   : > { %612 = vadd.xlane.f32.xlu1 %v611_v51 }
 0x6cb   : > { %v610_v52 = vpop.xlane.xlu0 %609 }
 0x6cc   : > { %1186 = vrcp.f32 %v610_v52 }
 0x6cf   : > { %v613_v53 = vpop.xlane.xlu1 %612 }
 0x6d0   : > { %1188 = vrcp.f32 %v613_v53 }
 0x6d6   : > { %v1187_v54 = vpop.eup %1186 }
 0x6d7   : > { %v616_v55 = vmul.f32 %v1187_v54, %v606_v47 }
 0x6d9   : > { %618 = vst.msk [vmem:[#allocation3] sm:$0xff] %vm491_vm2, %v616_v55 }
 0x6da   : > { %v1189_v42 = vpop.eup %1188 }
 0x6db   : > { %v617_v56 = vmul.f32 %v1189_v42, %v607_v50 }
 0x6dd   : > { %619 = vst.msk [vmem:[#allocation3 + $0x8] sm:$0xff] %vm491_vm2, %v617_v56 }
 0x6de PF: > { %v1190_v45 = vld [vmem:[%s1308_s14] sm:$0xff]   ;;  %v1236_v48 = vmov 0.0   ;;  %v1191_v57 = vld [vmem:[%s1308_s14 + $0x8] sm:$0xff]   ;;  %vm1237_vm1 = vmmov 0   ;;  %vm639_vm3 = vcmask 261120   ;;  %v1196_v63 = vld [vmem:[%s1318_s20 + $0x10] sm:$0xff]   ;;  %v863_v5 = vlaneseq }
 0x6df   : > { %1108 = vmatprep.subr.bf16.mxu1 %v1236_v48  ;;  %1124 = vmatprep.subr.bf16.mxu0 %v1236_v48  ;;  %v622_v58 = vld [vmem:[#allocation2] sm:$0xff]  ;;  %v1193_v60 = vld [vmem:[%s1313_s17 + $0x8] sm:$0xff]   ;;  %v1197_v0 = vld [vmem:[%s1318_s20 + $0x18] sm:$0xff]   ;;  %v865_v6 = vstv %s1224_s27  ;;  %vm871_vm2 = vcmask 31744   ;;  %p1071_p6 = scmp.ne.s32.totalorder %s1224_s27, 3 }
 0x6e0   : > { %1109 = vmatpush3.bf16.msra.mxu1 %v1190_v45  ;;  %1112 = vmatprep.mubr.msk.bf16.mxu1 %vm1237_vm1, %v1236_v48  ;;  %v1192_v59 = vld [vmem:[%s1313_s17] sm:$0xff]   ;;  %v1195_v62 = vld [vmem:[%s1318_s20 + $0x8] sm:$0xff]   ;;  %v1200_v3 = vld [vmem:[%s1318_s20 + $0x30] sm:$0xff]   ;;  %v864_v7 = vand.u32 127, %v863_v5 }
 0x6e1   : > { %1110 = vmatprep.subr.bf16.mxu1 %v1236_v48  ;;  %1140 = vmatprep.mubr.msk.bf16.mxu0 %vm1237_vm1, %v1236_v48  ;;  %v1194_v61 = vld [vmem:[%s1318_s20] sm:$0xff]   ;;  %v1199_v2 = vld [vmem:[%s1318_s20 + $0x28] sm:$0xff]   ;;  %v1201_v4 = vld [vmem:[%s1318_s20 + $0x38] sm:$0xff]  }
 0x6e2   : > { %1125 = vmatpush3.bf16.msra.mxu0 %v1194_v61  ;;  %v1198_v1 = vld [vmem:[%s1318_s20 + $0x20] sm:$0xff]   ;;  %v867_v8 = vld [vmem:[#allocation3] sm:$0xff]  ;;  %vm866_vm4 = vcmp.eq.s32.totalorder %v864_v7, %v865_v6  ;;  %v878_v37 = vld [vmem:[#allocation4] sm:$0xff] }
 0x6e3   : > { %1126 = vmatprep.subr.bf16.mxu0 %v1236_v48  ;;  %v869_v10 = vsel %vm866_vm4, %v867_v8, 0.0  ;;  %v879_v43 = vld [vmem:[#allocation4 + $0x8] sm:$0xff]  ;;  %v891_v54 = vld [vmem:[%s1440_s0 + $0x8] sm:$0xff] (!%p1071_p6) }
 0x6e4   : > { %1111 = vmatpush3.bf16.msra.mxu1 %v1191_v57  ;;  %v868_v9 = vld [vmem:[#allocation3 + $0x8] sm:$0xff]  ;;  %v872_v12 = vsel %vm871_vm2, %v869_v10, 0.0  ;;  %v890_v50 = vld [vmem:[%s1440_s0] sm:$0xff] (!%p1071_p6) }
 0x6e5   : > { %1116 = vmatprep.subr.bf16.mxu1 %v1236_v48  ;;  %v870_v11 = vsel %vm866_vm4, %v868_v9, 0.0  ;;  %873 = vadd.xlane.f32.xlu0 %v872_v12  ;;  %v1072_v51 = vld [vmem:[%s1446_s6] ss:$0 sm:$0xff] (!%p1071_p6) }
 0x6e6   : > { %1127 = vmatpush3.bf16.msra.mxu0 %v1195_v62  ;;  %v875_v13 = vsel %vm871_vm2, %v870_v11, 0.0 }
 0x6e7   : > { %1113 = vmatmul.mubr.msk.bf16.vlgmr.msra.gmra.mrb[0].mxu1 %vm639_vm3, %v622_v58  ;;  %1128 = vmatprep.subr.bf16.mxu0 %v1236_v48 }
 0x6e8   : > { %1117 = vmatpush3.bf16.msra.mxu1 %v1192_v59  ;;  %1120 = vmatprep.mubr.msk.bf16.mxu1 %vm1237_vm1, %v1236_v48 }
 0x6e9   : > { %1118 = vmatprep.subr.bf16.mxu1 %v1236_v48  ;;  %876 = vadd.xlane.f32.xlu0 %v875_v13 }
 0x6ea   : > { %1129 = vmatpush3.bf16.msra.mxu0 %v1196_v63 }
 0x6eb   : > { %1130 = vmatprep.subr.bf16.mxu0 %v1236_v48 }
 0x6ec   : > { %1119 = vmatpush3.bf16.msra.mxu1 %v1193_v60 }
 0x6ee   : > { %1131 = vmatpush3.bf16.msra.mxu0 %v1197_v0 }
 0x6ef   : > { %1121 = vmatmul.mubr.msk.bf16.vlgmr.msra.gmra.mrb[4].mxu1 %vm639_vm3, %v622_v58  ;;  %1132 = vmatprep.subr.bf16.mxu0 %v1236_v48 }
 0x6f2   : > { %1133 = vmatpush3.bf16.msra.mxu0 %v1198_v1 }
 0x6f3   : > { %1134 = vmatprep.subr.bf16.mxu0 %v1236_v48 }
 0x6f6   : > { %1135 = vmatpush3.bf16.msra.mxu0 %v1199_v2 }
 0x6f7   : > { %1136 = vmatprep.subr.bf16.mxu0 %v1236_v48 }
 0x6fa   : > { %1137 = vmatpush3.bf16.msra.mxu0 %v1200_v3 }
 0x6fb   : > { %1138 = vmatprep.subr.bf16.mxu0 %v1236_v48 }
 0x6fe   : > { %1139 = vmatpush3.bf16.msra.mxu0 %v1201_v4 }
 0x772   : > { %v874_v35 = vpop.xlane.xlu0 %873 }
 0x776   : > { %v877_v38 = vpop.xlane.xlu0 %876 }
 0x7ba   : > { %v677_v14 = vpop.f32.mrb[0].mxu1 }
 0x7bb   : > { %v1061_v15 = vmul.f32 -1.442695, %v677_v14  ;;  %v1114_v16 = vpop.f32.mrb[1].mxu1 }
 0x7bc   : > { %v680_v17 = vpop.f32.mrb[2].mxu1 }
 0x7bd   : > { %1202 = vpow2.f32 %v1061_v15  ;;  %v1062_v18 = vmul.f32 -1.442695, %v680_v17  ;;  %v1115_v19 = vpop.f32.mrb[3].mxu1 }
 0x7bf   : > { %1204 = vpow2.f32 %v1062_v18 }
 0x7c2   : > { %v734_v20 = vpop.f32.mrb[4].mxu1 }
 0x7c3   : > { %v1122_v21 = vpop.f32.mrb[5].mxu1 }
 0x7c4   : > { %v737_v22 = vpop.f32.mrb[6].mxu1 }
 0x7c5   : > { %v1123_v23 = vpop.f32.mrb[7].mxu1 }
 0x7c7   : > { %v1203_v24 = vpop.eup %1202 }
 0x7c8   : > { %v747_v25 = vadd.f32 1.0, %v1203_v24 }
 0x7c9   : > { %v1205_v26 = vpop.eup %1204 }
 0x7ca   : > { %1206 = vrcp.f32 %v747_v25  ;;  %v748_v27 = vadd.f32 1.0, %v1205_v26 }
 0x7cc   : > { %1208 = vrcp.f32 %v748_v27 }
 0x7d4   : > { %v1207_v28 = vpop.eup %1206 }
 0x7d5   : > { %v753_v29 = vmul.f32 %v1207_v28, %v677_v14 }
 0x7d6   : > { %v1209_v30 = vpop.eup %1208 }
 0x7d7   : > { %v754_v31 = vmul.f32 %v1209_v30, %v680_v17  ;;  %v755_v32 = vmul.f32 %v753_v29, %v734_v20 }
 0x7d9   : > { %v756_v33 = vmul.f32 %v754_v31, %v737_v22 }
 0x7db   : > { %v757_v34 = vpack.c.bf16 %v756_v33, %v755_v32 }
 0x7dd   : > { %1141 = vmatmul.mubr.bf16.vlgmr.msra.gmra.mrb[0].mxu0 %v757_v34 }
 0x8b0   : > { %v856_v36 = vpop.f32.mrb[0].mxu0 }
 0x8b1   : > { %v880_v39 = vmul.f32 %v874_v35, %v856_v36  ;;  %v1142_v40 = vpop.f32.mrb[1].mxu0  ;;  %889 = sbr.rel (%p1071_p6) target bundleno = 2244 (0x8c4), region = 56 }
 0x8b2   : > { %v859_v41 = vpop.f32.mrb[2].mxu0 }
 0x8b3   : > { %v882_v44 = vadd.f32 %v880_v39, %v878_v37  ;;  %v881_v46 = vmul.f32 %v877_v38, %v859_v41  ;;  %v1143_v47 = vpop.f32.mrb[3].mxu0 }
 0x8b5   : > { %884 = vst.msk [vmem:[#allocation4] sm:$0xff] %vm639_vm3, %v882_v44  ;;  %v883_v49 = vadd.f32 %v881_v46, %v879_v43 }
 0x8b7   : > { %885 = vst.msk [vmem:[#allocation4 + $0x8] sm:$0xff] %vm639_vm3, %v883_v49 }
 0x8bc   : > { %v893_v52 = vld [vmem:[#allocation4] sm:$0xff] }
 0x8bd   : > { %v901_v53 = vmul.f32 %v1072_v51, %v893_v52 }
 0x8be   : > { %v894_v55 = vld [vmem:[#allocation4 + $0x8] sm:$0xff] }
 0x8bf   : > { %v902_v42 = vmul.f32 %v1072_v51, %v894_v55  ;;  %v903_v56 = vadd.f32 %v901_v53, %v890_v50 }
 0x8c1   : > { %v904_v45 = vadd.f32 %v902_v42, %v891_v54  ;;  %905 = vst.msk [vmem:[%s1447_s7] sm:$0xff] %vm639_vm3, %v903_v56 }
 0x8c3   : > { %906 = vst.msk [vmem:[%s1447_s7 + $0x8] sm:$0xff] %vm639_vm3, %v904_v45 }
 0x8c4 PF: > { %s19_s29 = sadd.s32 1, %s1232_s29   ;;  %s1449_s27 = smov %s1228_s28 }
 0x8c5   : > { %p16_p7 = scmp.ge.s32.totalorder %s19_s29, 6   ;;  %s1450_s28 = smov %s1452_s30 }
 0x8c7   :  { %18 = sbr.rel (!%p16_p7) target bundleno = 2 (0x2), region = 107 }

// kernel: cross_modal_decoder_layer.2
= control target key start
LH: loop header
LB: loop body
LE: loop exit
PB: predicated region body
PF: predicated region fallthrough
CT: control target
= control target key end

     0   :  { %s1940_s18 = smov 0   ;;  %s2203_s0 = inlined_call_operand.vmem [shape: f32[2,8,32], index: 0, kind: input, shape index: {}]   ;;  %s2204_s1 = inlined_call_operand.vmem [shape: f32[2,16,64], index: 1, kind: input, shape index: {}]   ;;  %s2205_s2 = inlined_call_operand.vmem [shape: f32[2,1,16], index: 2, kind: input, shape index: {}]   ;;  %s2206_s3 = inlined_call_operand.vmem [shape: f32[1,32], index: 3, kind: input, shape index: {}]   ;;  %s2207_s4 = inlined_call_operand.vmem [shape: bf16[32,32], index: 4, kind: input, shape index: {}]   ;;  %s2208_s5 = inlined_call_operand.vmem [shape: f32[1,32], index: 5, kind: input, shape index: {}]   ;;  %s2209_s6 = inlined_call_operand.vmem [shape: bf16[64,16], index: 6, kind: input, shape index: {}]   ;;  %s2210_s7 = inlined_call_operand.vmem [shape: f32[1,16], index: 7, kind: input, shape index: {}]   ;;  %s2211_s8 = inlined_call_operand.vmem [shape: bf16[64,16], index: 8, kind: input, shape index: {}]   ;;  %s2212_s9 = inlined_call_operand.vmem [shape: f32[1,16], index: 9, kind: input, shape index: {}]   ;;  %s2213_s10 = inlined_call_operand.vmem [shape: f32[1,1,8], index: 10, kind: input, shape index: {}]   ;;  %s2214_s11 = inlined_call_operand.vmem [shape: f32[1,1,8], index: 11, kind: input, shape index: {}]   ;;  %s2215_s12 = inlined_call_operand.vmem [shape: bf16[4,8,32], index: 12, kind: input, shape index: {}]   ;;  %s2216_s13 = inlined_call_operand.vmem [shape: f32[1,32], index: 13, kind: input, shape index: {}]   ;;  %s2217_s14 = inlined_call_operand.vmem [shape: f32[1,32], index: 14, kind: input, shape index: {}]   ;;  %s2218_s15 = inlined_call_operand.vmem [shape: f32[2,8,32], index: 15, kind: output, shape index: {}]  }
   0x1 LB: > { %s1598_s19 = sadd.s32 4294967295, %s1853_s18   ;;  %p1602_p0 = scmp.ge.s32.totalorder %s1853_s18, 1  ;;  %s1853_s18 = sphi %s1940_s18, %s25_s18  }
   0x2   : > { %p454_p1 = scmp.lt.s32.totalorder %s1853_s18, 3 }
   0x4   : > { %p455_p2 = pnand %p1602_p0, %p454_p1 }
   0x5   : > { %v1803_v0 = vld [vmem:[%s2209_s6] sm:$0xff] (!%p455_p2)   ;;  %v1855_v1 = vmov (!%p455_p2), 0.0   ;;  %p508_p3 = scmp.lt.s32.totalorder (!%p455_p2), %s1598_s19, 1  ;;  %v1804_v2 = vld [vmem:[%s2209_s6 + $0x8] sm:$0xff] (!%p455_p2)   ;;  %v1805_v3 = vld [vmem:[%s2209_s6 + $0x10] sm:$0xff] (!%p455_p2)   ;;  %vm1856_vm0 = vmmov (!%p455_p2), 0  }
   0x6   : > { %458 = sbr.rel (%p455_p2) target bundleno = 1652 (0x674), region = 80  ;;  %1689 = vmatprep.subr.bf16.mxu1 (!%p455_p2), %v1855_v1  ;;  %1681 = vmatprep.subr.bf16.mxu0 (!%p455_p2), %v1855_v1  ;;  %vm531_vm1 = vcmask (!%p455_p2), 261120   ;;  %v1806_v7 = vld [vmem:[%s2209_s6 + $0x18] sm:$0xff] (!%p455_p2)   ;;  %vm654_vm2 = vcmask (!%p455_p2), 523264   ;;  %v1807_v11 = vld [vmem:[%s2207_s4] sm:$0xff] (!%p455_p2)   ;;  %v1808_v12 = vld [vmem:[%s2207_s4 + $0x8] sm:$0xff] (!%p455_p2)  }
   0x7   : > { %1690 = vmatpush3.bf16.msra.mxu1 (!%p455_p2), %v1803_v0  ;;  %1697 = vmatprep.mubr.msk.bf16.mxu1 (!%p455_p2), %vm1856_vm0, %v1855_v1  ;;  %v1607_v17 = vld [vmem:[%s2206_s3] ss:$0 sm:$0xff] (!%p455_p2)  ;;  %s1857_s17 = smov (!%p455_p2), 120   ;;  %vm809_vm3 = vcmask (!%p455_p2), 64512   ;;  %s1858_s22 = smov (!%p455_p2), 112   ;;  %v1810_v47 = vld [vmem:[%s2211_s8 + $0x8] sm:$0xff] (!%p455_p2)  }
   0x8   : > { %1691 = vmatprep.subr.bf16.mxu1 (!%p455_p2), %v1855_v1  ;;  %1685 = vmatprep.mubr.msk.bf16.mxu0 (!%p455_p2), %vm1856_vm0, %v1855_v1  ;;  %v1612_v21 = vld [vmem:[%s2210_s7] ss:$0 sm:$0xff] (!%p455_p2)  ;;  %s1859_s23 = smov (!%p455_p2), 104   ;;  %v1811_v48 = vld [vmem:[%s2211_s8 + $0x10] sm:$0xff] (!%p455_p2)   ;;  %v1812_v49 = vld [vmem:[%s2211_s8 + $0x18] sm:$0xff] (!%p455_p2)   ;;  %vm1083_vm4 = vcmask (!%p455_p2), 130048  }
   0x9   : > { %1682 = vmatpush3.bf16.msra.mxu0 (!%p455_p2), %v1807_v11  ;;  %v1608_v33 = vld [vmem:[%s2208_s5] ss:$0 sm:$0xff] (!%p455_p2)  ;;  %vm1317_vm5 = vcmask (!%p455_p2), 1043456  }
   0xa   : > { %1683 = vmatprep.subr.bf16.mxu0 (!%p455_p2), %v1855_v1  ;;  %v1809_v46 = vld [vmem:[%s2211_s8] sm:$0xff] (!%p455_p2)  }
   0xb   : > { %1692 = vmatpush3.bf16.msra.mxu1 (!%p455_p2), %v1804_v2 }
   0xc   : > { %1693 = vmatprep.subr.bf16.mxu1 (!%p455_p2), %v1855_v1 }
   0xd   : > { %s2220_s19 = smov (!%p508_p3, %s1598_s19), 1  ;;  %1684 = vmatpush3.bf16.msra.mxu0 %v1808_v12 }
   0xe   : > { %s1603_s26 = sshll.u32 %s2220_s19, 3  ;;  %s1643_s27 = sshll.u32 %s2220_s19, 4  ;;  %1701 = vmatprep.subr.bf16.mxu0 %v1855_v1 }
   0xf   : > { %s511_s30 = scalar_lea.vmem %s2203_s0, %s1603_s26  ;;  %s516_s20 = scalar_lea.vmem %s2204_s1, %s1643_s27  ;;  %1694 = vmatpush3.bf16.msra.mxu1 %v1805_v3 }
  0x10   : > { %v1974_v4 = vld [vmem:[%s511_s30] sm:$0xff]  ;;  %v527_v9 = vld [vmem:[%s516_s20 + $0x8] sm:$0xff]  ;;  %1695 = vmatprep.subr.bf16.mxu1 %v1855_v1  ;;  %s519_s30 = scalar_lea.vmem %s2205_s2, %s2220_s19 }
  0x11   : > { %v530_v5 = vmul.f32 %v1974_v4, %v1974_v4  ;;  %v526_v8 = vld [vmem:[%s516_s20] sm:$0xff]  ;;  %s523_s20 = scalar_lea.vmem %s2218_s15, %s1603_s26 }
  0x12   : > { %v1986_v10 = vpack.c.bf16 %v527_v9, %v526_v8 }
  0x13   : > { %v532_v6 = vsel %vm531_vm1, %v530_v5, 0.0  ;;  %1696 = vmatpush3.bf16.msra.mxu1 %v1806_v7 }
  0x14   : > { %533 = vadd.xlane.f32.xlu0 %v532_v6  ;;  %1713 = vmatprep.subr.bf16.mxu1 %v1855_v1 }
  0x16   : > { %1698 = vmatmul.mubr.msk.bf16.vlgmr.msra.gmra.mrb[0].mxu1 %vm654_vm2, %v1986_v10 }
  0x17   : > { %1715 = vmatprep.mubr.msk.bf16.mxu1 %vm1856_vm0, %v1855_v1 }
  0xa1   : > { %v534_v13 = vpop.xlane.xlu0 %533 }
  0xa2   : > { %v536_v14 = vmul.f32 0.03125, %v534_v13 }
  0xa4   : > { %v537_v15 = vadd.f32 1e-06, %v536_v14 }
  0xa6   : > { %1813 = vrsqrt.f32 %v537_v15  ;;  %v1625_v15 = vld [vmem:[%s2214_s11] ss:$0 sm:$0xff] }
  0xb0   : > { %v1814_v16 = vpop.eup %1813 }
  0xb1   : > { %v539_v18 = vmul.f32 %v1814_v16, %v1974_v4 }
  0xb3   : > { %v546_v19 = vmul.f32 %v1607_v17, %v539_v18 }
  0xb5   : > { %v547_v20 = vpack.c.bf16 %v546_v19, %v546_v19 }
  0xb7   : > { %1686 = vmatmul.mubr.msk.bf16.vlgmr.msra.gmra.mrb[0].mxu0 %vm531_vm1, %v547_v20 }
  0xb8   : > { %1709 = vmatprep.mubr.msk.bf16.mxu0 %vm1856_vm0, %v1855_v1  ;;  %1702 = vmatpush3.bf16.msra.mxu0 %v1809_v46 }
  0xb9   : > { %1703 = vmatprep.subr.bf16.mxu0 %v1855_v1 }
  0xbc   : > { %1704 = vmatpush3.bf16.msra.mxu0 %v1810_v47 }
  0xbd   : > { %1705 = vmatprep.subr.bf16.mxu0 %v1855_v1 }
  0xc0   : > { %1706 = vmatpush3.bf16.msra.mxu0 %v1811_v48 }
  0xc1   : > { %1707 = vmatprep.subr.bf16.mxu0 %v1855_v1 }
  0xc4   : > { %1708 = vmatpush3.bf16.msra.mxu0 %v1812_v49 }
  0xc5   : > { %1719 = vmatprep.subr.bf16.mxu0 %v1855_v1 }
  0xc7   : > { %1710 = vmatmul.mubr.msk.bf16.vlgmr.msra.gmra.mrb[4].mxu0 %vm654_vm2, %v1986_v10 }
  0xc8   : > { %1721 = vmatprep.mubr.msk.bf16.mxu0 %vm1856_vm0, %v1855_v1 }
  0xe9   : > { %v692_v22 = vpop.f32.mrb[0].mxu1 }
  0xea   : > { %v2011_v23 = vadd.f32 %v1612_v21, %v692_v22  ;;  %v1699_v24 = vpop.f32.mrb[1].mxu1 }
  0xeb   : > { %v695_v25 = vpop.f32.mrb[2].mxu1 }
  0xec   : > { %v2013_v26 = vadd.f32 %v1612_v21, %v695_v25  ;;  %791 = vrot.lane.b32.xlu0 %v2011_v23, %s1857_s17  ;;  %v1700_v27 = vpop.f32.mrb[3].mxu1  ;;  %v850_v39 = vmul.f32 %v2011_v23, %v2011_v23 }
  0xee   : > { %793 = vrot.lane.b32.xlu1 %v2013_v26, %s1857_s17  ;;  %v851_v28 = vmul.f32 %v2013_v26, %v2013_v26  ;;  %v854_v42 = vsel %vm809_vm3, %v850_v39, 0.0 }
  0xf0   : > { %v857_v29 = vsel %vm809_vm3, %v851_v28, 0.0  ;;  %v1624_v28 = vld [vmem:[%s2213_s10] ss:$0 sm:$0xff] }
 0x10b   : > { %858 = vadd.xlane.f32.xlu0 %v857_v29 }
 0x15e   : > { %v2038_v40 = vpop.permute.xlu0 %791 }
 0x15f   : > { %v852_v41 = vmul.f32 %v2038_v40, %v2038_v40 }
 0x160   : > { %v2022_v30 = vpop.permute.xlu1 %793 }
 0x161   : > { %v853_v31 = vmul.f32 %v2022_v30, %v2022_v30  ;;  %v860_v43 = vsel %vm809_vm3, %v852_v41, 0.0 }
 0x163   : > { %v863_v32 = vsel %vm809_vm3, %v853_v31, 0.0 }
 0x164   : > { %864 = vadd.xlane.f32.xlu0 %v863_v32 }
 0x18a   : > { %v609_v34 = vpop.f32.mrb[0].mxu0 }
 0x18b   : > { %v2030_v35 = vadd.f32 %v1608_v33, %v609_v34  ;;  %v1687_v36 = vpop.f32.mrb[1].mxu0 }
 0x18c   : > { %v612_v37 = vpop.f32.mrb[2].mxu0 }
 0x18d   : > { %780 = vrot.lane.b32.xlu1 %v2030_v35, %s1857_s17  ;;  %v1688_v38 = vpop.f32.mrb[3].mxu0  ;;  %v805_v44 = vmul.f32 %v2030_v35, %v2030_v35 }
 0x18f   : > { %v810_v45 = vsel %vm809_vm3, %v805_v44, 0.0 }
 0x191   : > { %783 = vrot.lane.b32.xlu1 %v2030_v35, %s1858_s22 }
 0x195   : > { %786 = vrot.lane.b32.xlu1 %v2030_v35, %s1859_s23 }
 0x198   : > { %v859_v59 = vpop.xlane.xlu0 %858 }
 0x199   : > { %v867_v60 = vmul.f32 0.125, %v859_v59 }
 0x19b   : > { %v871_v62 = vadd.f32 1e-06, %v867_v60 }
 0x19d   : > { %1815 = vrsqrt.f32 %v871_v62 }
 0x1a7   : > { %v1816_v11 = vpop.eup %1815 }
 0x1a8   : > { %v879_v13 = vmul.f32 %v1816_v11, %v2013_v26 }
 0x1aa   : > { %v890_v19 = vmul.f32 %v1625_v15, %v879_v13 }
 0x1b9   : > { %855 = vadd.xlane.f32.xlu1 %v854_v42 }
 0x1bd   : > { %861 = vadd.xlane.f32.xlu1 %v860_v43 }
 0x1c1   : > { %811 = vadd.xlane.f32.xlu1 %v810_v45 }
 0x1f1   : > { %v865_v61 = vpop.xlane.xlu0 %864 }
 0x1f2   : > { %v869_v63 = vmul.f32 0.125, %v865_v61 }
 0x1f4   : > { %v873_v3 = vadd.f32 1e-06, %v869_v63 }
 0x1ff   : > { %v2067_v50 = vpop.permute.xlu1 %780 }
 0x200   : > { %v806_v51 = vmul.f32 %v2067_v50, %v2067_v50 }
 0x202   : > { %v813_v52 = vsel %vm809_vm3, %v806_v51, 0.0 }
 0x203   : > { %v2072_v53 = vpop.permute.xlu1 %783  ;;  %814 = vadd.xlane.f32.xlu1 %v813_v52 }
 0x204   : > { %v807_v54 = vmul.f32 %v2072_v53, %v2072_v53 }
 0x206   : > { %v816_v55 = vsel %vm809_vm3, %v807_v54, 0.0 }
 0x207   : > { %817 = vadd.xlane.f32.xlu0 %v816_v55  ;;  %v2077_v56 = vpop.permute.xlu1 %786  ;;  %v1618_v55 = vld [vmem:[%s2212_s9] ss:$0 sm:$0xff] }
 0x208   : > { %v808_v57 = vmul.f32 %v2077_v56, %v2077_v56 }
 0x20a   : > { %v819_v58 = vsel %vm809_vm3, %v808_v57, 0.0 }
 0x20b   : > { %820 = vadd.xlane.f32.xlu1 %v819_v58 }
 0x246   : > { %v856_v0 = vpop.xlane.xlu1 %855 }
 0x247   : > { %v866_v2 = vmul.f32 0.125, %v856_v0  ;;  %v1626_v0 = vld [vmem:[%s519_s30] ss:$0 sm:$0xff] }
 0x249   : > { %v870_v5 = vadd.f32 1e-06, %v866_v2 }
 0x24a   : > { %v862_v6 = vpop.xlane.xlu1 %861 }
 0x24b   : > { %1817 = vrsqrt.f32 %v870_v5  ;;  %v868_v7 = vmul.f32 0.125, %v862_v6 }
 0x24c   : > { %1819 = vrsqrt.f32 %v873_v3 }
 0x24d   : > { %v872_v8 = vadd.f32 1e-06, %v868_v7 }
 0x24e   : > { %v812_v9 = vpop.xlane.xlu1 %811 }
 0x24f   : > { %1821 = vrsqrt.f32 %v872_v8  ;;  %v823_v10 = vmul.f32 0.125, %v812_v9 }
 0x251   : > { %v827_v12 = vadd.f32 1e-06, %v823_v10 }
 0x253   : > { %1823 = vrsqrt.f32 %v827_v12 }
 0x255   : > { %v1818_v14 = vpop.eup %1817 }
 0x256   : > { %v878_v16 = vmul.f32 %v1818_v14, %v2011_v23  ;;  %v1820_v17 = vpop.eup %1819 }
 0x257   : > { %v881_v24 = vmul.f32 %v1820_v17, %v2022_v30 }
 0x258   : > { %v889_v18 = vmul.f32 %v1625_v15, %v878_v16 }
 0x259   : > { %v1822_v20 = vpop.eup %1821  ;;  %v892_v29 = vmul.f32 %v1625_v15, %v881_v24 }
 0x25a   : > { %v897_v21 = vpack.c.bf16 %v890_v19, %v889_v18  ;;  %v880_v22 = vmul.f32 %v1822_v20, %v2038_v40 }
 0x25c   : > { %v909_v25 = vsel %vm809_vm3, %v897_v21, 0  ;;  %v891_v27 = vmul.f32 %v1625_v15, %v880_v22 }
 0x25d   : > { %v1824_v26 = vpop.eup %1823  ;;  %1714 = vmatpush3.bf16.xpose.msra.mxu1 %v909_v25  ;;  %1720 = vmatpush3.bf16.xpose.msra.mxu0 %v909_v25 }
 0x25e   : > { %v835_v23 = vmul.f32 %v1824_v26, %v2030_v35  ;;  %1725 = vmatprep.subr.bf16.mxu1 %v1855_v1  ;;  %1731 = vmatprep.subr.bf16.mxu0 %v1855_v1  ;;  %v898_v32 = vpack.c.bf16 %v892_v29, %v891_v27 }
 0x260   : > { %v846_v31 = vmul.f32 %v1624_v28, %v835_v23  ;;  %v998_v33 = vsel %vm809_vm3, %v898_v32, 0 }
 0x262   : > { %v893_v30 = vpack.c.bf16 %v846_v31, %v846_v31 }
 0x264   : > { %1716 = vmatmul.mubr.msk.bf16.vlgmr.msra.gmra.mrb[4].mxu1 %vm809_vm3, %v893_v30 }
 0x265   : > { %1726 = vmatpush3.bf16.xpose.msra.mxu1 %v998_v33  ;;  %1727 = vmatprep.mubr.msk.bf16.mxu1 %vm1856_vm0, %v1855_v1 }
 0x266   : > { %1737 = vmatprep.subr.bf16.mxu1 %v1855_v1 }
 0x290   : > { %v815_v34 = vpop.xlane.xlu1 %814 }
 0x291   : > { %v824_v35 = vmul.f32 0.125, %v815_v34 }
 0x293   : > { %v828_v36 = vadd.f32 1e-06, %v824_v35 }
 0x294   : > { %v818_v37 = vpop.xlane.xlu0 %817 }
 0x295   : > { %1825 = vrsqrt.f32 %v828_v36  ;;  %v825_v38 = vmul.f32 0.125, %v818_v37 }
 0x297   : > { %v829_v39 = vadd.f32 1e-06, %v825_v38 }
 0x298   : > { %v821_v40 = vpop.xlane.xlu1 %820 }
 0x299   : > { %1827 = vrsqrt.f32 %v829_v39  ;;  %v826_v41 = vmul.f32 0.125, %v821_v40 }
 0x29b   : > { %v830_v42 = vadd.f32 1e-06, %v826_v41 }
 0x29d   : > { %1829 = vrsqrt.f32 %v830_v42 }
 0x29f   : > { %v1826_v43 = vpop.eup %1825 }
 0x2a0   : > { %v836_v44 = vmul.f32 %v1826_v43, %v2067_v50 }
 0x2a2   : > { %v847_v45 = vmul.f32 %v1624_v28, %v836_v44 }
 0x2a3   : > { %v1828_v46 = vpop.eup %1827 }
 0x2a4   : > { %v837_v47 = vmul.f32 %v1828_v46, %v2072_v53  ;;  %v894_v48 = vpack.c.bf16 %v847_v45, %v847_v45 }
 0x2a6   : > { %1722 = vmatmul.mubr.msk.bf16.vlgmr.msra.gmra.mrb[8].mxu0 %vm809_vm3, %v894_v48  ;;  %v848_v49 = vmul.f32 %v1624_v28, %v837_v47 }
 0x2a7   : > { %v1830_v51 = vpop.eup %1829  ;;  %1732 = vmatpush3.bf16.xpose.msra.mxu0 %v998_v33  ;;  %1733 = vmatprep.mubr.msk.bf16.mxu0 %vm1856_vm0, %v1855_v1 }
 0x2a8   : > { %v838_v52 = vmul.f32 %v1830_v51, %v2077_v56  ;;  %v895_v54 = vpack.c.bf16 %v848_v49, %v848_v49  ;;  %1743 = vmatprep.subr.bf16.mxu0 %v1855_v1  ;;  %v772_v56 = vpop.f32.mrb[4].mxu0 }
 0x2a9   : > { %v2117_v57 = vadd.f32 %v1618_v55, %v772_v56  ;;  %v1711_v58 = vpop.f32.mrb[5].mxu0 }
 0x2aa   : > { %1728 = vmatmul.mubr.msk.bf16.vlgmr.msra.gmra.mrb[8].mxu1 %vm809_vm3, %v895_v54  ;;  %v849_v50 = vmul.f32 %v1624_v28, %v838_v52  ;;  %v775_v59 = vpop.f32.mrb[6].mxu0 }
 0x2ab   : > { %1739 = vmatprep.mubr.msk.bf16.mxu1 %vm1856_vm0, %v1855_v1  ;;  %v2119_v60 = vadd.f32 %v1618_v55, %v775_v59  ;;  %v1712_v61 = vpop.f32.mrb[7].mxu0 }
 0x2ac   : > { %v896_v53 = vpack.c.bf16 %v849_v50, %v849_v50 }
 0x2ad   : > { %v1798_v62 = vpack.i.bf16 %v2119_v60, %v2117_v57  ;;  %v1132_v63 = vpack.c.bf16 %v2119_v60, %v2117_v57 }
 0x2ae   : > { %1734 = vmatmul.mubr.msk.bf16.vlgmr.msra.gmra.mrb[12].mxu0 %vm809_vm3, %v896_v53 }
 0x2af   : > { %1745 = vmatprep.mubr.msk.bf16.mxu0 %vm1856_vm0, %v1855_v1  ;;  %1738 = vmatpush3.bf16.msra.mxu1 %v1132_v63 }
 0x2b0   : > { %1744 = vmatpush3.bf16.msra.mxu0 %v1132_v63  ;;  %1749 = vmatprep.subr.bf16.mxu1 %v1855_v1 }
 0x2b1   : > { %1755 = vmatprep.subr.bf16.mxu0 %v1855_v1 }
 0x337   : > { %v945_v2 = vpop.f32.mrb[4].mxu1 }
 0x338   : > { %v946_v3 = vadd.f32 %v1626_v0, %v945_v2  ;;  %v1717_v5 = vpop.f32.mrb[5].mxu1 }
 0x339   : > { %v948_v6 = vpop.f32.mrb[6].mxu1  ;;  %v1310_v5 = vld [vmem:[%s2215_s12] sm:$0xf] }
 0x33a   : > { %v1718_v7 = vpop.f32.mrb[7].mxu1  ;;  %v1084_v8 = vsel %vm1083_vm4, %v946_v3, -inf  ;;  %v1319_v6 = vsel %vm1317_vm5, %v1310_v5, 0 }
 0x33b   : > { %1085 = vmax.xlane.f32.xlu0 %v1084_v8  ;;  %v1311_v7 = vld [vmem:[%s2215_s12 + $0x4] sm:$0xf] }
 0x33c   : > { %v1365_v8 = vsel %vm1317_vm5, %v1311_v7, 0 }
 0x379   : > { %v988_v9 = vpop.f32.mrb[8].mxu0 }
 0x37a   : > { %v989_v10 = vadd.f32 %v1626_v0, %v988_v9  ;;  %v1723_v11 = vpop.f32.mrb[9].mxu0  ;;  %v1312_v9 = vld [vmem:[%s2215_s12 + $0x8] sm:$0xf] }
 0x37b   : > { %v991_v12 = vpop.f32.mrb[10].mxu0 }
 0x37c   : > { %v1724_v13 = vpop.f32.mrb[11].mxu0  ;;  %v1087_v14 = vsel %vm1083_vm4, %v989_v10, -inf }
 0x37d   : > { %1088 = vmax.xlane.f32.xlu1 %v1087_v14  ;;  %v1034_v15 = vpop.f32.mrb[8].mxu1  ;;  %v1411_v13 = vsel %vm1317_vm5, %v1312_v9, 0 }
 0x37e   : > { %v1035_v16 = vadd.f32 %v1626_v0, %v1034_v15  ;;  %v1729_v17 = vpop.f32.mrb[9].mxu1 }
 0x37f   : > { %v1037_v18 = vpop.f32.mrb[10].mxu1 }
 0x380   : > { %v1730_v19 = vpop.f32.mrb[11].mxu1  ;;  %v1090_v20 = vsel %vm1083_vm4, %v1035_v16, -inf }
 0x381   : > { %v1077_v21 = vpop.f32.mrb[12].mxu0  ;;  %1091 = vmax.xlane.f32.xlu0 %v1090_v20 }
 0x382   : > { %v1078_v22 = vadd.f32 %v1626_v0, %v1077_v21  ;;  %v1735_v24 = vpop.f32.mrb[13].mxu0 }
 0x383   : > { %v1080_v25 = vpop.f32.mrb[14].mxu0 }
 0x384   : > { %v1736_v27 = vpop.f32.mrb[15].mxu0  ;;  %v1093_v26 = vsel %vm1083_vm4, %v1078_v22, -inf }
 0x385   : > { %1094 = vmax.xlane.f32.xlu1 %v1093_v26 }
 0x3c8   : > { %v1086_v28 = vpop.xlane.xlu0 %1085 }
 0x3c9   : > { %v1096_v23 = vsub.f32 %v946_v3, %v1086_v28 }
 0x3cb   : > { %v1100_v29 = vmul.f32 1.442695, %v1096_v23 }
 0x3cd   : > { %1831 = vpow2.f32 %v1100_v29 }
 0x3d7   : > { %v1832_v31 = vpop.eup %1831 }
 0x3d8   : > { %v1108_v32 = vsel %vm1083_vm4, %v1832_v31, 0.0 }
 0x3d9   : > { %1109 = vadd.xlane.f32.xlu0 %v1108_v32 }
 0x40a   : > { %v1089_v30 = vpop.xlane.xlu1 %1088 }
 0x40b   : > { %v1097_v33 = vsub.f32 %v989_v10, %v1089_v30 }
 0x40d   : > { %v1102_v34 = vmul.f32 1.442695, %v1097_v33 }
 0x40e   : > { %v1092_v35 = vpop.xlane.xlu0 %1091 }
 0x40f   : > { %1833 = vpow2.f32 %v1102_v34  ;;  %v1098_v36 = vsub.f32 %v1035_v16, %v1092_v35  ;;  %v1313_v16 = vld [vmem:[%s2215_s12 + $0xc] sm:$0xf] }
 0x410   : > { %v1457_v20 = vsel %vm1317_vm5, %v1313_v16, 0 }
 0x411   : > { %v1104_v37 = vmul.f32 1.442695, %v1098_v36 }
 0x412   : > { %v1095_v38 = vpop.xlane.xlu1 %1094 }
 0x413   : > { %1835 = vpow2.f32 %v1104_v37  ;;  %v1099_v39 = vsub.f32 %v1078_v22, %v1095_v38 }
 0x415   : > { %v1106_v40 = vmul.f32 1.442695, %v1099_v39 }
 0x417   : > { %1837 = vpow2.f32 %v1106_v40 }
 0x419   : > { %v1834_v41 = vpop.eup %1833 }
 0x41a   : > { %v1111_v42 = vsel %vm1083_vm4, %v1834_v41, 0.0 }
 0x41b   : > { %1112 = vadd.xlane.f32.xlu1 %v1111_v42 }
 0x41d   : > { %v1836_v43 = vpop.eup %1835 }
 0x41e   : > { %v1114_v44 = vsel %vm1083_vm4, %v1836_v43, 0.0 }
 0x41f   : > { %1115 = vadd.xlane.f32.xlu0 %v1114_v44 }
 0x421   : > { %v1838_v45 = vpop.eup %1837 }
 0x422   : > { %v1117_v46 = vsel %vm1083_vm4, %v1838_v45, 0.0 }
 0x423   : > { %1118 = vadd.xlane.f32.xlu1 %v1117_v46 }
 0x435   : > { %1799 = vrot.lane.b32.xlu0 %v1798_v62, %s1857_s17 }
 0x466   : > { %v1110_v47 = vpop.xlane.xlu0 %1109 }
 0x467   : > { %1839 = vrcp.f32 %v1110_v47 }
 0x471   : > { %v1840_v48 = vpop.eup %1839 }
 0x472   : > { %v1124_v49 = vmul.f32 %v1840_v48, %v1832_v31 }
 0x474   : > { %v1128_v51 = vpack.c.bf16 %v1124_v49, %v1124_v49 }
 0x476   : > { %1740 = vmatmul.mubr.msk.bf16.vlgmr.msra.gmra.mrb[12].mxu1 %vm1083_vm4, %v1128_v51 }
 0x477   : > { %1751 = vmatprep.mubr.msk.bf16.mxu1 %vm1856_vm0, %v1855_v1 }
 0x4a8   : > { %v1113_v52 = vpop.xlane.xlu1 %1112 }
 0x4a9   : > { %1841 = vrcp.f32 %v1113_v52  ;;  %v1639_v52 = vld [vmem:[%s2216_s13] ss:$0 sm:$0xff] }
 0x4ac   : > { %v1116_v54 = vpop.xlane.xlu0 %1115 }
 0x4ad   : > { %1843 = vrcp.f32 %v1116_v54 }
 0x4b0   : > { %v1119_v50 = vpop.xlane.xlu1 %1118  ;;  %v1800_v53 = vpop.permute.xlu0 %1799 }
 0x4b1   : > { %1845 = vrcp.f32 %v1119_v50  ;;  %v1802_v55 = vunpack.i.h.bf16 %v1800_v53  ;;  %v1801_v56 = vunpack.i.l.bf16 %v1800_v53 }
 0x4b3   : > { %v1842_v57 = vpop.eup %1841  ;;  %v1133_v58 = vpack.c.bf16 %v1802_v55, %v1801_v56  ;;  %v1640_v55 = vld [vmem:[%s2217_s14] ss:$0 sm:$0xff] }
 0x4b4   : > { %v1125_v59 = vmul.f32 %v1842_v57, %v1834_v41 }
 0x4b5   : > { %1750 = vmatpush3.bf16.msra.mxu1 %v1133_v58 }
 0x4b6   : > { %v1129_v60 = vpack.c.bf16 %v1125_v59, %v1125_v59  ;;  %1761 = vmatprep.subr.bf16.mxu1 %v1855_v1 }
 0x4b7   : > { %v1844_v61 = vpop.eup %1843 }
 0x4b8   : > { %v1126_v62 = vmul.f32 %v1844_v61, %v1836_v43  ;;  %1746 = vmatmul.mubr.msk.bf16.vlgmr.msra.gmra.mrb[16].mxu0 %vm1083_vm4, %v1129_v60 }
 0x4b9   : > { %1756 = vmatpush3.bf16.msra.mxu0 %v1133_v58  ;;  %1757 = vmatprep.mubr.msk.bf16.mxu0 %vm1856_vm0, %v1855_v1 }
 0x4ba   : > { %v1130_v63 = vpack.c.bf16 %v1126_v62, %v1126_v62  ;;  %1767 = vmatprep.subr.bf16.mxu0 %v1855_v1 }
 0x4bb   : > { %v1846_v0 = vpop.eup %1845 }
 0x4bc   : > { %v1127_v2 = vmul.f32 %v1846_v0, %v1838_v45  ;;  %1752 = vmatmul.mubr.msk.bf16.vlgmr.msra.gmra.mrb[16].mxu1 %vm1083_vm4, %v1130_v63 }
 0x4bd   : > { %1763 = vmatprep.mubr.msk.bf16.mxu1 %vm1856_vm0, %v1855_v1  ;;  %1762 = vmatpush3.bf16.msra.mxu1 %v1319_v6 }
 0x4be   : > { %v1131_v3 = vpack.c.bf16 %v1127_v2, %v1127_v2  ;;  %1773 = vmatprep.subr.bf16.mxu1 %v1855_v1 }
 0x4c0   : > { %1758 = vmatmul.mubr.msk.bf16.vlgmr.msra.gmra.mrb[20].mxu0 %vm1083_vm4, %v1131_v3 }
 0x4c1   : > { %1769 = vmatprep.mubr.msk.bf16.mxu0 %vm1856_vm0, %v1855_v1  ;;  %1768 = vmatpush3.bf16.msra.mxu0 %v1365_v8 }
 0x4c2   : > { %1779 = vmatprep.subr.bf16.mxu0 %v1855_v1 }
 0x549   : > { %v1171_v10 = vpop.f32.mrb[12].mxu1 }
 0x54a   : > { %v1306_v11 = vpack.c.bf16 %v1171_v10, %v1171_v10  ;;  %v1741_v12 = vpop.f32.mrb[13].mxu1 }
 0x54b   : > { %v1174_v14 = vpop.f32.mrb[14].mxu1 }
 0x54c   : > { %v1742_v15 = vpop.f32.mrb[15].mxu1  ;;  %1764 = vmatmul.mubr.msk.bf16.vlgmr.msra.gmra.mrb[20].mxu1 %vm809_vm3, %v1306_v11 }
 0x54d   : > { %1774 = vmatpush3.bf16.msra.mxu1 %v1411_v13  ;;  %1775 = vmatprep.mubr.msk.bf16.mxu1 %vm1856_vm0, %v1855_v1 }
 0x58b   : > { %v1214_v17 = vpop.f32.mrb[16].mxu0 }
 0x58c   : > { %v1307_v18 = vpack.c.bf16 %v1214_v17, %v1214_v17  ;;  %v1747_v19 = vpop.f32.mrb[17].mxu0 }
 0x58d   : > { %v1217_v21 = vpop.f32.mrb[18].mxu0 }
 0x58e   : > { %v1748_v22 = vpop.f32.mrb[19].mxu0  ;;  %1770 = vmatmul.mubr.msk.bf16.vlgmr.msra.gmra.mrb[24].mxu0 %vm809_vm3, %v1307_v18 }
 0x58f   : > { %1780 = vmatpush3.bf16.msra.mxu0 %v1457_v20  ;;  %v1257_v24 = vpop.f32.mrb[16].mxu1  ;;  %1781 = vmatprep.mubr.msk.bf16.mxu0 %vm1856_vm0, %v1855_v1 }
 0x590   : > { %v1308_v25 = vpack.c.bf16 %v1257_v24, %v1257_v24  ;;  %v1753_v27 = vpop.f32.mrb[17].mxu1 }
 0x591   : > { %v1260_v26 = vpop.f32.mrb[18].mxu1 }
 0x592   : > { %v1754_v28 = vpop.f32.mrb[19].mxu1  ;;  %1776 = vmatmul.mubr.msk.bf16.vlgmr.msra.gmra.mrb[24].mxu1 %vm809_vm3, %v1308_v25 }
 0x593   : > { %v1300_v23 = vpop.f32.mrb[20].mxu0 }
 0x594   : > { %v1309_v29 = vpack.c.bf16 %v1300_v23, %v1300_v23  ;;  %v1759_v31 = vpop.f32.mrb[21].mxu0 }
 0x595   : > { %v1303_v32 = vpop.f32.mrb[22].mxu0 }
 0x596   : > { %v1760_v30 = vpop.f32.mrb[23].mxu0  ;;  %1782 = vmatmul.mubr.msk.bf16.vlgmr.msra.gmra.mrb[28].mxu0 %vm809_vm3, %v1309_v29 }
 0x61f   : > { %v1355_v33 = vpop.f32.mrb[20].mxu1 }
 0x620   : > { %v1765_v34 = vpop.f32.mrb[21].mxu1  ;;  %v1499_v1 = vsel %vm531_vm1, %v1355_v33, 0.0 }
 0x621   : > { %v1358_v35 = vpop.f32.mrb[22].mxu1 }
 0x622   : > { %v1766_v36 = vpop.f32.mrb[23].mxu1 }
 0x661   : > { %v1401_v37 = vpop.f32.mrb[24].mxu0 }
 0x662   : > { %v1500_v38 = vsel %vm531_vm1, %v1401_v37, 0.0  ;;  %v1771_v39 = vpop.f32.mrb[25].mxu0 }
 0x663   : > { %v1501_v40 = vadd.f32 %v1500_v38, %v1499_v1  ;;  %v1404_v41 = vpop.f32.mrb[26].mxu0 }
 0x664   : > { %v1772_v42 = vpop.f32.mrb[27].mxu0 }
 0x665   : > { %v1447_v43 = vpop.f32.mrb[24].mxu1 }
 0x666   : > { %v1502_v44 = vsel %vm531_vm1, %v1447_v43, 0.0  ;;  %v1777_v45 = vpop.f32.mrb[25].mxu1 }
 0x667   : > { %v1503_v46 = vadd.f32 %v1502_v44, %v1501_v40  ;;  %v1450_v47 = vpop.f32.mrb[26].mxu1 }
 0x668   : > { %v1778_v48 = vpop.f32.mrb[27].mxu1 }
 0x669   : > { %v1493_v49 = vpop.f32.mrb[28].mxu0 }
 0x66a   : > { %v1504_v51 = vsel %vm531_vm1, %v1493_v49, 0.0  ;;  %v1783_v54 = vpop.f32.mrb[29].mxu0 }
 0x66b   : > { %v1505_v50 = vadd.f32 %v1504_v51, %v1503_v46  ;;  %v1496_v53 = vpop.f32.mrb[30].mxu0 }
 0x66c   : > { %v1784_v56 = vpop.f32.mrb[31].mxu0 }
 0x66d   : > { %v1513_v57 = vadd.f32 %v1639_v52, %v1505_v50 }
 0x66f   : > { %v1521_v58 = vmul.f32 %v1640_v55, %v1513_v57 }
 0x671   : > { %v1522_v59 = vadd.f32 %v1521_v58, %v1974_v4 }
 0x673   : > { %1523 = vst.msk [vmem:[%s523_s20] sm:$0xff] %vm531_vm1, %v1522_v59 }
 0x674 PF: > { %s25_s18 = sadd.s32 1, %s1853_s18  }
 0x675   : > { %p22_p4 = scmp.ge.s32.totalorder %s25_s18, 4  }
 0x677   :  { %24 = sbr.rel (!%p22_p4) target bundleno = 1 (0x1), region = 116 }

</bundles_post_ra>
